<compile_context>
chip_gen: v5e
topology: v5e:2x2
jax: 0.10.0
libtpu: 0.0.40
codegen_flags: <defaults>
</compile_context>

<pallas_src>
import jax
import jax.numpy as jnp
from jax import lax
from jax.experimental import pallas as pl
from jax.experimental.pallas import tpu as pltpu

_LANE = 128   # channel dims are padded to a multiple of the TPU lane width


def _round_up(v, m):
    return (v + m - 1) // m * m


def _hw_budget():
    """(row-tile cap in flattened rows, vmem_limit_bytes) per TPU generation."""
    try:
        vmem = pltpu.get_tpu_info().vmem_capacity_bytes
    except Exception:                       # unknown chip / query unavailable
        vmem = 64 * 1024 * 1024
    if vmem >= 96 * 1024 * 1024:            # v5e / v6e: 128 MiB VMEM
        return 2048, 64 * 1024 * 1024
    return 1024, 40 * 1024 * 1024           # v7x: 64 MiB per TensorCore


def _pick_tile_h(h, w, row_cap):
    """Largest multiple-of-8 divisor of `h` whose flattened row tile fits the cap."""
    divisors = [d for d in range(8, h + 1, 8) if h % d == 0]
    if not divisors:
        return h
    small = [d for d in divisors if d * w <= row_cap]
    return max(small) if small else min(divisors)


def _bottleneck_kernel(x_ref, above_ref, below_ref,
                       s1_ref, t1_ref, w1_ref, d2_ref,
                       wall_ref, d3_ref, w3_ref, b3_ref,
                       o_ref, y3_ref):
    """One (batch, row-tile) grid step.

    x_ref     : (1, TH, W, Cp)   input rows of this tile (NHWC, lane-padded)
    above_ref : (1, 1,  W, Cp)   image row just above the tile (clamped at border)
    below_ref : (1, 1,  W, Cp)   image row just below the tile (clamped at border)
    y3_ref    : (TW, 3*Pp)       VMEM scratch holding the kh-stacked conv2 operand
    conv weights carry the folded BN scales and are stored in the MXU dtype.
    """
    _, th, w, c = x_ref.shape
    pp = w1_ref.shape[1]
    tw = th * w
    mxu = w1_ref.dtype
    ydt = y3_ref.dtype
    f32 = jnp.float32

    s1 = s1_ref[...]
    t1 = t1_ref[...]
    d2 = d2_ref[...]

    def bn1_conv1(v):
        """bn1 + relu + conv1(1x1, bn2 scale folded in) + relu -> (rows, Pp) f32."""
        t = jnp.maximum(v.astype(f32) * s1 + t1, 0.0)
        return jnp.maximum(
            jnp.dot(t.astype(mxu), w1_ref[...],
                    preferred_element_type=f32) + d2, 0.0)

    # 0/1 validity of the halo rows (conv2's zero padding at the image border).
    i = pl.program_id(1)
    vt = jnp.where(i > 0, 1.0, 0.0)
    vb = jnp.where(i < pl.num_programs(1) - 1, 1.0, 0.0)

    # ---- bn1/relu/conv1/relu, written straight into the kh-stacked conv2 operand:
    #      y3[s, kh*Pp:(kh+1)*Pp] = y[s + (kh-1)*W]  (flattened row index s). ----
    x2d = x_ref[0].reshape(tw, c)
    ym = bn1_conv1(x2d)                                           # (TW, Pp) f32
    y3_ref[:, pp:2 * pp] = ym.astype(ydt)                         # kh = 1 (centre)
    y3_ref[w:tw, 0:pp] = ym[0:tw - w].astype(ydt)                 # kh = 0
    y3_ref[0:w, 0:pp] = (bn1_conv1(above_ref[0, 0]) * vt).astype(ydt)
    y3_ref[0:tw - w, 2 * pp:] = ym[w:tw].astype(ydt)              # kh = 2
    y3_ref[tw - w:tw, 2 * pp:] = (bn1_conv1(below_ref[0, 0]) * vb).astype(ydt)

    # ---- conv2 (3x3, bn3 scale folded in): ONE K = 3*Pp MXU matmul.  Only the
    #      +-1 column taps remain; their wrapped rows land exactly on the
    #      column-masked border positions, so a plain roll is safe. ----
    z = jnp.dot(y3_ref[...], wall_ref[...],
                preferred_element_type=f32)                       # (TW, 3*Pp) f32

    col = lax.broadcasted_iota(jnp.int32, (th, w, pp), 1).reshape(tw, pp)
    zl = jnp.roll(z[:, 0:pp], 1, axis=0)                          # z[s-1], kw = 0
    zr = jnp.roll(z[:, 2 * pp:], -1, axis=0)                      # z[s+1], kw = 2
    acc = z[:, pp:2 * pp] \
        + jnp.where(col > 0, zl, 0.0) \
        + jnp.where(col < w - 1, zr, 0.0)

    # ---- bn3 shift (conv2 bias folded in) + relu ----
    a3 = jnp.maximum(acc + d3_ref[...], 0.0)

    # ---- conv3 (1x1) + bias + residual ----
    out = jnp.dot(a3.astype(mxu), w3_ref[...],
                  preferred_element_type=f32) + b3_ref[...] + x2d.astype(f32)
    o_ref[0] = out.reshape(th, w, c).astype(o_ref.dtype)


def prepare_params(raw, *, eps=1e-5, weight_dtype=jnp.bfloat16, lane=_LANE):
    """Fold eval-mode BN + biases into the convs, pad channels to a lane multiple,
    pack the 3x3 kernel as a kh-folded (3*Pp, 3*Pp) matrix, cast MXU operands."""

    def fold(g, b, m, var):
        sc = g / jnp.sqrt(var + eps)
        return sc, b - m * sc

    s1, t1 = fold(*raw["bn1"])
    s2, t2 = fold(*raw["bn2"])
    s3, t3 = fold(*raw["bn3"])

    w1 = raw["w1"][:, :, 0, 0].T                        # (Cin, P)
    w2 = jnp.transpose(raw["w2"], (2, 3, 1, 0))         # (kh, kw, in, out)
    w3 = raw["w3"][:, :, 0, 0].T                        # (P, Cout)
    cin, p = w1.shape
    cout = w3.shape[1]

    w1f = w1 * s2[None, :]                              # bn2 scale -> conv1 weight
    d2 = raw["b1"] * s2 + t2                            # conv1 bias + bn2 shift
    w2f = w2 * s3[None, None, None, :]                  # bn3 scale -> conv2 weight
    d3 = raw["b2"] * s3 + t3                            # conv2 bias + bn3 shift

    cp = _round_up(max(cin, cout), lane)
    pp = _round_up(p, lane)

    def vec(v, n):
        return jnp.pad(v, (0, n - v.shape[0])).reshape(1, n).astype(jnp.float32)

    w1p = jnp.pad(w1f, ((0, cp - cin), (0, pp - p)))
    w2p = jnp.pad(w2f, ((0, 0), (0, 0), (0, pp - p), (0, pp - p)))
    # kh folded into the contraction: rows = (kh, cin), cols = (kw, cout).
    wall = jnp.transpose(w2p, (0, 2, 1, 3)).reshape(3 * pp, 3 * pp)
    w3p = jnp.pad(w3, ((0, pp - p), (0, cp - cout)))

    return dict(
        s1=vec(s1, cp), t1=vec(t1, cp),
        w1=w1p.astype(weight_dtype), d2=vec(d2, pp),
        wall=wall.astype(weight_dtype), d3=vec(d3, pp),
        w3=w3p.astype(weight_dtype), b3=vec(raw["b3"], cp),
        cin=cin, cout=cout)


def bottleneck2d_forward(x_nhwc, kp, *, tile_h=None):
    """Bottleneck2D forward, NHWC layout; output dtype follows the input dtype
    (use bf16 activations for the performance path, f32 for strict checks).

    Implements the default-constructor config: stride=1, downsample=None,
    inplanes == planes * expansion (asserted).
    """
    n, h, w, cin = x_nhwc.shape
    cp, pp = kp["w1"].shape
    cout = kp["cout"]
    assert cin == kp["cin"] and cin == cout, \
        "residual add requires inplanes == planes * expansion (no downsample)"

    x_p = x_nhwc if cin == cp else jnp.pad(
        x_nhwc, ((0, 0), (0, 0), (0, 0), (0, cp - cin)))

    row_cap, vmem_limit = _hw_budget()
    if tile_h is None:
        tile_h = _pick_tile_h(h, w, row_cap)
    assert h % tile_h == 0, "row tile must divide H"
    ht = h // tile_h
    tw = tile_h * w

    def cmap(shape):
        return pl.BlockSpec(shape, lambda b, i: (0,) * len(shape))

    # Halo rows via clamped element-row indices (block size 1 along H).  At the
    # image border the clamped row content is never used (the corresponding y
    # band is zeroed in-kernel).
    above_spec = pl.BlockSpec(
        (1, 1, w, cp), lambda b, i: (b, jnp.maximum(i * tile_h - 1, 0), 0, 0))
    below_spec = pl.BlockSpec(
        (1, 1, w, cp), lambda b, i: (b, jnp.minimum((i + 1) * tile_h, h - 1), 0, 0))

    out = pl.pallas_call(
        _bottleneck_kernel,
        out_shape=jax.ShapeDtypeStruct((n, h, w, cp), x_nhwc.dtype),
        grid_spec=pltpu.PrefetchScalarGridSpec(
            num_scalar_prefetch=0,
            grid=(n, ht),
            in_specs=[
                pl.BlockSpec((1, tile_h, w, cp), lambda b, i: (b, i, 0, 0)),
                above_spec,
                below_spec,
                cmap((1, cp)), cmap((1, cp)),
                cmap((cp, pp)), cmap((1, pp)),
                cmap((3 * pp, 3 * pp)), cmap((1, pp)),
                cmap((pp, cp)), cmap((1, cp)),
            ],
            out_specs=pl.BlockSpec((1, tile_h, w, cp), lambda b, i: (b, i, 0, 0)),
            scratch_shapes=[pltpu.VMEM((tw, 3 * pp), kp["w1"].dtype)],
        ),
        compiler_params=pltpu.CompilerParams(
            dimension_semantics=("parallel", "parallel"),
            vmem_limit_bytes=vmem_limit),
    )(x_p, x_p, x_p,
      kp["s1"], kp["t1"], kp["w1"], kp["d2"],
      kp["wall"], kp["d3"], kp["w3"], kp["b3"])

    return out if cp == cout else out[..., :cout]


def make_raw_params(key, inplanes, planes):
    """Deterministic synthetic params in PyTorch layout (OIHW weights, BN stats)."""
    p, cout = planes, planes * 2
    ks = jax.random.split(key, 18)

    def u(k, shape, scale=0.2):
        return jax.random.uniform(k, shape, jnp.float32, -scale, scale)

    g1, be1 = u(ks[0], (inplanes,)) + 1.0, u(ks[1], (inplanes,))
    m1, v1 = u(ks[2], (inplanes,)), u(ks[3], (inplanes,)) + 1.0
    g2, be2 = u(ks[4], (p,)) + 1.0, u(ks[5], (p,))
    m2, v2 = u(ks[6], (p,)), u(ks[7], (p,)) + 1.0
    g3, be3 = u(ks[8], (p,)) + 1.0, u(ks[9], (p,))
    m3, v3 = u(ks[10], (p,)), u(ks[11], (p,)) + 1.0

    w1 = u(ks[12], (p, inplanes, 1, 1), 0.5)
    w2 = u(ks[13], (p, p, 3, 3), 0.3)
    w3 = u(ks[14], (cout, p, 1, 1), 0.5)
    b1 = u(ks[15], (p,), 0.1)
    b2 = u(ks[16], (p,), 0.1)
    b3 = u(ks[17], (cout,), 0.1)

    return dict(bn1=(g1, be1, m1, v1), bn2=(g2, be2, m2, v2), bn3=(g3, be3, m3, v3),
                w1=w1, w2=w2, w3=w3, b1=b1, b2=b2, b3=b3)


def reference_forward(x_nchw, raw, eps=1e-5):
    """Pure-JAX reference matching PyTorch Bottleneck2D (eval-mode BN, stride=1)."""
    def bn(v, g, b, m, var):
        sh = (1, -1, 1, 1)
        return (v - m.reshape(sh)) / jnp.sqrt(var.reshape(sh) + eps) * g.reshape(sh) \
            + b.reshape(sh)

    dn = ("NCHW", "OIHW", "NCHW")
    out = jax.nn.relu(bn(x_nchw, *raw["bn1"]))
    out = lax.conv_general_dilated(out, raw["w1"], (1, 1), "VALID",
                                   dimension_numbers=dn) + raw["b1"].reshape(1, -1, 1, 1)
    out = jax.nn.relu(bn(out, *raw["bn2"]))
    out = lax.conv_general_dilated(out, raw["w2"], (1, 1), ((1, 1), (1, 1)),
                                   dimension_numbers=dn) + raw["b2"].reshape(1, -1, 1, 1)
    out = jax.nn.relu(bn(out, *raw["bn3"]))
    out = lax.conv_general_dilated(out, raw["w3"], (1, 1), "VALID",
                                   dimension_numbers=dn) + raw["b3"].reshape(1, -1, 1, 1)
    return out + x_nchw


if __name__ == "__main__":
    key = jax.random.PRNGKey(0)
    kx, kparam = jax.random.split(key)

    n, inplanes, planes, h, w = 2, 8, 4, 16, 16      # inplanes == planes * expansion
    x_nhwc = jax.random.normal(kx, (n, h, w, inplanes), jnp.float32)
    raw = make_raw_params(kparam, inplanes, planes)

    # Pure-JAX reference in the module's native NCHW layout (transposed only for
    # verification; the kernel path itself is transpose-free).
    ref = reference_forward(jnp.transpose(x_nhwc, (0, 3, 1, 2)), raw)
    ref_nhwc = jnp.transpose(ref, (0, 2, 3, 1))

    # 1) strict functional check: f32 everywhere, multi-tile (halo path exercised).
    kp_f32 = prepare_params(raw, weight_dtype=jnp.float32)
    out_a = jax.block_until_ready(bottleneck2d_forward(x_nhwc, kp_f32, tile_h=8))
    assert out_a.shape == (n, h, w, planes * 2)
    err_a = float(jnp.max(jnp.abs(out_a - ref_nhwc)))
    assert err_a < 5e-4, f"f32 tiled max abs err {err_a}"

    # 2) strict functional check: default (single-tile) blocking.
    out_b = jax.block_until_ready(bottleneck2d_forward(x_nhwc, kp_f32))
    err_b = float(jnp.max(jnp.abs(out_b - ref_nhwc)))
    assert err_b < 5e-4, f"f32 single-tile max abs err {err_b}"

    # 3) performance config: bf16 activations on the HBM path + bf16 MXU weights,
    #    f32 accumulation; validated with a reference-scaled (relative) bound.
    kp_bf16 = prepare_params(raw, weight_dtype=jnp.bfloat16)
    out_c = jax.block_until_ready(
        bottleneck2d_forward(x_nhwc.astype(jnp.bfloat16), kp_bf16, tile_h=8))
    assert out_c.dtype == jnp.bfloat16
    scale = float(jnp.max(jnp.abs(ref_nhwc)))
    err_c = float(jnp.max(jnp.abs(out_c.astype(jnp.float32) - ref_nhwc)))
    assert err_c < 0.06 * scale + 0.06, \
        f"bf16 max abs err {err_c} (ref scale {scale})"

    print("KERNEL_OK")
</pallas_src>

<mosaic_0001>
module attributes {stable_mosaic.version = 11 : i64} {
  func.func @_bottleneck_kernel(%arg0: i32, %arg1: i32, %arg2: memref<1x8x16x128xf32, #tpu.memory_space<vmem>>, %arg3: memref<1x1x16x128xf32, #tpu.memory_space<vmem>>, %arg4: memref<1x1x16x128xf32, #tpu.memory_space<vmem>>, %arg5: memref<1x128xf32, #tpu.memory_space<vmem>>, %arg6: memref<1x128xf32, #tpu.memory_space<vmem>>, %arg7: memref<128x128xf32, #tpu.memory_space<vmem>>, %arg8: memref<1x128xf32, #tpu.memory_space<vmem>>, %arg9: memref<384x384xf32, #tpu.memory_space<vmem>>, %arg10: memref<1x128xf32, #tpu.memory_space<vmem>>, %arg11: memref<128x128xf32, #tpu.memory_space<vmem>>, %arg12: memref<1x128xf32, #tpu.memory_space<vmem>>, %arg13: memref<1x8x16x128xf32, #tpu.memory_space<vmem>>, %arg14: memref<128x384xf32, #tpu.memory_space<vmem>>) attributes {dimension_semantics = [#tpu.dimension_semantics<parallel>, #tpu.dimension_semantics<parallel>], iteration_bounds = array<i64: 2, 2>, scalar_prefetch = 0 : i64, scratch_operands = 1 : i64, tpu.core_type = #tpu.core_type<tc>, window_params = [{transform_indices = @transform_0, window_bounds = array<i64: 1, 8, 16, 128>}, {transform_indices = @transform_1, window_bounds = array<i64: 1, 1, 16, 128>}, {transform_indices = @transform_2, window_bounds = array<i64: 1, 1, 16, 128>}, {pipeline_mode = #tpu.pipeline_mode<synchronous>, transform_indices = @transform_3, window_bounds = array<i64: 1, 128>}, {pipeline_mode = #tpu.pipeline_mode<synchronous>, transform_indices = @transform_4, window_bounds = array<i64: 1, 128>}, {pipeline_mode = #tpu.pipeline_mode<synchronous>, transform_indices = @transform_5, window_bounds = array<i64: 128, 128>}, {pipeline_mode = #tpu.pipeline_mode<synchronous>, transform_indices = @transform_6, window_bounds = array<i64: 1, 128>}, {pipeline_mode = #tpu.pipeline_mode<synchronous>, transform_indices = @transform_7, window_bounds = array<i64: 384, 384>}, {pipeline_mode = #tpu.pipeline_mode<synchronous>, transform_indices = @transform_8, window_bounds = array<i64: 1, 128>}, {pipeline_mode = #tpu.pipeline_mode<synchronous>, transform_indices = @transform_9, window_bounds = array<i64: 128, 128>}, {pipeline_mode = #tpu.pipeline_mode<synchronous>, transform_indices = @transform_10, window_bounds = array<i64: 1, 128>}, {transform_indices = @transform_11, window_bounds = array<i64: 1, 8, 16, 128>}]} {
    %c0 = arith.constant 0 : index
    %c0_0 = arith.constant 0 : index
    %0 = vector.load %arg5[%c0, %c0_0] : memref<1x128xf32, #tpu.memory_space<vmem>>, vector<1x128xf32>
    %c0_1 = arith.constant 0 : index
    %c0_2 = arith.constant 0 : index
    %1 = vector.load %arg6[%c0_1, %c0_2] : memref<1x128xf32, #tpu.memory_space<vmem>>, vector<1x128xf32>
    %c0_3 = arith.constant 0 : index
    %c0_4 = arith.constant 0 : index
    %2 = vector.load %arg8[%c0_3, %c0_4] : memref<1x128xf32, #tpu.memory_space<vmem>>, vector<1x128xf32>
    %c0_i32 = arith.constant 0 : i32
    %3 = arith.cmpi sgt, %arg1, %c0_i32 : i32
    %cst = arith.constant 1.000000e+00 : f32
    %cst_5 = arith.constant 0.000000e+00 : f32
    %4 = arith.select %3, %cst, %cst_5 : f32
    %c1_i32 = arith.constant 1 : i32
    %5 = arith.cmpi slt, %arg1, %c1_i32 : i32
    %cst_6 = arith.constant 1.000000e+00 : f32
    %cst_7 = arith.constant 0.000000e+00 : f32
    %6 = arith.select %5, %cst_6, %cst_7 : f32
    %c0_8 = arith.constant 0 : index
    %c0_9 = arith.constant 0 : index
    %c0_10 = arith.constant 0 : index
    %c0_11 = arith.constant 0 : index
    %7 = vector.load %arg2[%c0_8, %c0_9, %c0_10, %c0_11] : memref<1x8x16x128xf32, #tpu.memory_space<vmem>>, vector<1x8x16x128xf32>
    %8 = vector.shape_cast %7 : vector<1x8x16x128xf32> to vector<8x16x128xf32>
    %9 = vector.shape_cast %8 : vector<8x16x128xf32> to vector<128x128xf32>
    %10 = vector.broadcast %0 : vector<1x128xf32> to vector<128x128xf32>
    %11 = arith.mulf %9, %10 : vector<128x128xf32>
    %12 = vector.broadcast %1 : vector<1x128xf32> to vector<128x128xf32>
    %13 = arith.addf %11, %12 : vector<128x128xf32>
    %cst_12 = arith.constant 0.000000e+00 : f32
    %14 = vector.broadcast %cst_12 : f32 to vector<128x128xf32>
    %15 = arith.maximumf %13, %14 : vector<128x128xf32>
    %c0_13 = arith.constant 0 : index
    %c0_14 = arith.constant 0 : index
    %16 = vector.load %arg7[%c0_13, %c0_14] : memref<128x128xf32, #tpu.memory_space<vmem>>, vector<128x128xf32>
    %cst_15 = arith.constant dense<0.000000e+00> : vector<128x128xf32>
    %17 = tpu.matmul %15, %16, %cst_15 {dimension_numbers = #tpu.dot_dimension_numbers<[1], [0], [0], [1], [0, 0, 1, 1], [], []>} : vector<128x128xf32>, vector<128x128xf32>, vector<128x128xf32> -> vector<128x128xf32>
    %18 = vector.broadcast %2 : vector<1x128xf32> to vector<128x128xf32>
    %19 = arith.addf %17, %18 : vector<128x128xf32>
    %cst_16 = arith.constant 0.000000e+00 : f32
    %20 = vector.broadcast %cst_16 : f32 to vector<128x128xf32>
    %21 = arith.maximumf %19, %20 : vector<128x128xf32>
    %c0_17 = arith.constant 0 : index
    %c128 = arith.constant 128 : index
    %22 = vector.load %arg14[%c0_17, %c128] : memref<128x384xf32, #tpu.memory_space<vmem>>, vector<128x128xf32>
    tpu.vector_store %arg14[%c0_17, %c128], %21 {strides = array<i32>} : memref<128x384xf32, #tpu.memory_space<vmem>>, vector<128x128xf32>,
    %23 = vector.extract_strided_slice %21 {offsets = [0, 0], sizes = [112, 128], strides = [1, 1]} : vector<128x128xf32> to vector<112x128xf32>
    %c16 = arith.constant 16 : index
    %c0_18 = arith.constant 0 : index
    %24 = vector.load %arg14[%c16, %c0_18] : memref<128x384xf32, #tpu.memory_space<vmem>>, vector<112x128xf32>
    tpu.vector_store %arg14[%c16, %c0_18], %23 {strides = array<i32>} : memref<128x384xf32, #tpu.memory_space<vmem>>, vector<112x128xf32>,
    %c0_19 = arith.constant 0 : index
    %c0_20 = arith.constant 0 : index
    %c0_21 = arith.constant 0 : index
    %c0_22 = arith.constant 0 : index
    %25 = vector.load %arg3[%c0_19, %c0_20, %c0_21, %c0_22] : memref<1x1x16x128xf32, #tpu.memory_space<vmem>>, vector<1x1x16x128xf32>
    %26 = vector.shape_cast %25 : vector<1x1x16x128xf32> to vector<16x128xf32>
    %27 = vector.broadcast %0 : vector<1x128xf32> to vector<16x128xf32>
    %28 = arith.mulf %26, %27 : vector<16x128xf32>
    %29 = vector.broadcast %1 : vector<1x128xf32> to vector<16x128xf32>
    %30 = arith.addf %28, %29 : vector<16x128xf32>
    %cst_23 = arith.constant 0.000000e+00 : f32
    %31 = vector.broadcast %cst_23 : f32 to vector<16x128xf32>
    %32 = arith.maximumf %30, %31 : vector<16x128xf32>
    %c0_24 = arith.constant 0 : index
    %c0_25 = arith.constant 0 : index
    %33 = vector.load %arg7[%c0_24, %c0_25] : memref<128x128xf32, #tpu.memory_space<vmem>>, vector<128x128xf32>
    %cst_26 = arith.constant dense<0.000000e+00> : vector<16x128xf32>
    %34 = tpu.matmul %32, %33, %cst_26 {dimension_numbers = #tpu.dot_dimension_numbers<[1], [0], [0], [1], [0, 0, 1, 1], [], []>} : vector<16x128xf32>, vector<128x128xf32>, vector<16x128xf32> -> vector<16x128xf32>
    %35 = vector.broadcast %2 : vector<1x128xf32> to vector<16x128xf32>
    %36 = arith.addf %34, %35 : vector<16x128xf32>
    %cst_27 = arith.constant 0.000000e+00 : f32
    %37 = vector.broadcast %cst_27 : f32 to vector<16x128xf32>
    %38 = arith.maximumf %36, %37 : vector<16x128xf32>
    %39 = vector.broadcast %4 : f32 to vector<16x128xf32>
    %40 = arith.mulf %38, %39 : vector<16x128xf32>
    %c0_28 = arith.constant 0 : index
    %c0_29 = arith.constant 0 : index
    %41 = vector.load %arg14[%c0_28, %c0_29] : memref<128x384xf32, #tpu.memory_space<vmem>>, vector<16x128xf32>
    tpu.vector_store %arg14[%c0_28, %c0_29], %40 {strides = array<i32>} : memref<128x384xf32, #tpu.memory_space<vmem>>, vector<16x128xf32>,
    %42 = vector.extract_strided_slice %21 {offsets = [16, 0], sizes = [112, 128], strides = [1, 1]} : vector<128x128xf32> to vector<112x128xf32>
    %c0_30 = arith.constant 0 : index
    %c256 = arith.constant 256 : index
    %43 = vector.load %arg14[%c0_30, %c256] : memref<128x384xf32, #tpu.memory_space<vmem>>, vector<112x128xf32>
    tpu.vector_store %arg14[%c0_30, %c256], %42 {strides = array<i32>} : memref<128x384xf32, #tpu.memory_space<vmem>>, vector<112x128xf32>,
    %c0_31 = arith.constant 0 : index
    %c0_32 = arith.constant 0 : index
    %c0_33 = arith.constant 0 : index
    %c0_34 = arith.constant 0 : index
    %44 = vector.load %arg4[%c0_31, %c0_32, %c0_33, %c0_34] : memref<1x1x16x128xf32, #tpu.memory_space<vmem>>, vector<1x1x16x128xf32>
    %45 = vector.shape_cast %44 : vector<1x1x16x128xf32> to vector<16x128xf32>
    %46 = vector.broadcast %0 : vector<1x128xf32> to vector<16x128xf32>
    %47 = arith.mulf %45, %46 : vector<16x128xf32>
    %48 = vector.broadcast %1 : vector<1x128xf32> to vector<16x128xf32>
    %49 = arith.addf %47, %48 : vector<16x128xf32>
    %cst_35 = arith.constant 0.000000e+00 : f32
    %50 = vector.broadcast %cst_35 : f32 to vector<16x128xf32>
    %51 = arith.maximumf %49, %50 : vector<16x128xf32>
    %c0_36 = arith.constant 0 : index
    %c0_37 = arith.constant 0 : index
    %52 = vector.load %arg7[%c0_36, %c0_37] : memref<128x128xf32, #tpu.memory_space<vmem>>, vector<128x128xf32>
    %cst_38 = arith.constant dense<0.000000e+00> : vector<16x128xf32>
    %53 = tpu.matmul %51, %52, %cst_38 {dimension_numbers = #tpu.dot_dimension_numbers<[1], [0], [0], [1], [0, 0, 1, 1], [], []>} : vector<16x128xf32>, vector<128x128xf32>, vector<16x128xf32> -> vector<16x128xf32>
    %54 = vector.broadcast %2 : vector<1x128xf32> to vector<16x128xf32>
    %55 = arith.addf %53, %54 : vector<16x128xf32>
    %cst_39 = arith.constant 0.000000e+00 : f32
    %56 = vector.broadcast %cst_39 : f32 to vector<16x128xf32>
    %57 = arith.maximumf %55, %56 : vector<16x128xf32>
    %58 = vector.broadcast %6 : f32 to vector<16x128xf32>
    %59 = arith.mulf %57, %58 : vector<16x128xf32>
    %c112 = arith.constant 112 : index
    %c256_40 = arith.constant 256 : index
    %60 = vector.load %arg14[%c112, %c256_40] : memref<128x384xf32, #tpu.memory_space<vmem>>, vector<16x128xf32>
    tpu.vector_store %arg14[%c112, %c256_40], %59 {strides = array<i32>} : memref<128x384xf32, #tpu.memory_space<vmem>>, vector<16x128xf32>,
    %c0_41 = arith.constant 0 : index
    %c0_42 = arith.constant 0 : index
    %61 = vector.load %arg14[%c0_41, %c0_42] : memref<128x384xf32, #tpu.memory_space<vmem>>, vector<128x384xf32>
    %c0_43 = arith.constant 0 : index
    %c0_44 = arith.constant 0 : index
    %62 = vector.load %arg9[%c0_43, %c0_44] : memref<384x384xf32, #tpu.memory_space<vmem>>, vector<384x384xf32>
    %cst_45 = arith.constant dense<0.000000e+00> : vector<128x384xf32>
    %63 = tpu.matmul %61, %62, %cst_45 {dimension_numbers = #tpu.dot_dimension_numbers<[1], [0], [0], [1], [0, 0, 1, 1], [], []>} : vector<128x384xf32>, vector<384x384xf32>, vector<128x384xf32> -> vector<128x384xf32>
    %64 = tpu.iota {dimensions = array<i32: 1>} : vector<8x16x128xi32>
    %65 = vector.shape_cast %64 : vector<8x16x128xi32> to vector<128x128xi32>
    %66 = vector.extract_strided_slice %63 {offsets = [0, 0], sizes = [128, 128], strides = [1, 1]} : vector<128x384xf32> to vector<128x128xf32>
    %67 = vector.extract_strided_slice %66 {offsets = [127, 0], sizes = [1, 128], strides = [1, 1]} : vector<128x128xf32> to vector<1x128xf32>
    %68 = vector.extract_strided_slice %66 {offsets = [0, 0], sizes = [127, 128], strides = [1, 1]} : vector<128x128xf32> to vector<127x128xf32>
    %69 = tpu.concatenate %67, %68 in 0 : vector<1x128xf32>, vector<127x128xf32> -> vector<128x128xf32>
    %70 = vector.extract_strided_slice %63 {offsets = [0, 256], sizes = [128, 128], strides = [1, 1]} : vector<128x384xf32> to vector<128x128xf32>
    %71 = vector.extract_strided_slice %70 {offsets = [1, 0], sizes = [127, 128], strides = [1, 1]} : vector<128x128xf32> to vector<127x128xf32>
    %72 = vector.extract_strided_slice %70 {offsets = [0, 0], sizes = [1, 128], strides = [1, 1]} : vector<128x128xf32> to vector<1x128xf32>
    %73 = tpu.concatenate %71, %72 in 0 : vector<127x128xf32>, vector<1x128xf32> -> vector<128x128xf32>
    %74 = vector.extract_strided_slice %63 {offsets = [0, 128], sizes = [128, 128], strides = [1, 1]} : vector<128x384xf32> to vector<128x128xf32>
    %c0_i32_46 = arith.constant 0 : i32
    %75 = vector.broadcast %c0_i32_46 : i32 to vector<128x128xi32>
    %76 = arith.cmpi sgt, %65, %75 : vector<128x128xi32>
    %cst_47 = arith.constant 0.000000e+00 : f32
    %77 = vector.broadcast %cst_47 : f32 to vector<128x128xf32>
    %78 = arith.select %76, %69, %77 : vector<128x128xi1>, vector<128x128xf32>
    %79 = arith.addf %74, %78 : vector<128x128xf32>
    %c15_i32 = arith.constant 15 : i32
    %80 = vector.broadcast %c15_i32 : i32 to vector<128x128xi32>
    %81 = arith.cmpi slt, %65, %80 : vector<128x128xi32>
    %cst_48 = arith.constant 0.000000e+00 : f32
    %82 = vector.broadcast %cst_48 : f32 to vector<128x128xf32>
    %83 = arith.select %81, %73, %82 : vector<128x128xi1>, vector<128x128xf32>
    %84 = arith.addf %79, %83 : vector<128x128xf32>
    %c0_49 = arith.constant 0 : index
    %c0_50 = arith.constant 0 : index
    %85 = vector.load %arg10[%c0_49, %c0_50] : memref<1x128xf32, #tpu.memory_space<vmem>>, vector<1x128xf32>
    %86 = vector.broadcast %85 : vector<1x128xf32> to vector<128x128xf32>
    %87 = arith.addf %84, %86 : vector<128x128xf32>
    %cst_51 = arith.constant 0.000000e+00 : f32
    %88 = vector.broadcast %cst_51 : f32 to vector<128x128xf32>
    %89 = arith.maximumf %87, %88 : vector<128x128xf32>
    %c0_52 = arith.constant 0 : index
    %c0_53 = arith.constant 0 : index
    %90 = vector.load %arg11[%c0_52, %c0_53] : memref<128x128xf32, #tpu.memory_space<vmem>>, vector<128x128xf32>
    %cst_54 = arith.constant dense<0.000000e+00> : vector<128x128xf32>
    %91 = tpu.matmul %89, %90, %cst_54 {dimension_numbers = #tpu.dot_dimension_numbers<[1], [0], [0], [1], [0, 0, 1, 1], [], []>} : vector<128x128xf32>, vector<128x128xf32>, vector<128x128xf32> -> vector<128x128xf32>
    %c0_55 = arith.constant 0 : index
    %c0_56 = arith.constant 0 : index
    %92 = vector.load %arg12[%c0_55, %c0_56] : memref<1x128xf32, #tpu.memory_space<vmem>>, vector<1x128xf32>
    %93 = vector.broadcast %92 : vector<1x128xf32> to vector<128x128xf32>
    %94 = arith.addf %91, %93 : vector<128x128xf32>
    %95 = arith.addf %94, %9 : vector<128x128xf32>
    %96 = vector.shape_cast %95 : vector<128x128xf32> to vector<8x16x128xf32>
    %c0_57 = arith.constant 0 : index
    %c0_58 = arith.constant 0 : index
    %c0_59 = arith.constant 0 : index
    %c0_60 = arith.constant 0 : index
    %97 = vector.load %arg13[%c0_57, %c0_58, %c0_59, %c0_60] : memref<1x8x16x128xf32, #tpu.memory_space<vmem>>, vector<1x8x16x128xf32>
    %98 = vector.shape_cast %97 : vector<1x8x16x128xf32> to vector<8x16x128xf32>
    %99 = vector.shape_cast %96 : vector<8x16x128xf32> to vector<1x8x16x128xf32>
    tpu.vector_store %arg13[%c0_57, %c0_58, %c0_59, %c0_60], %99 {strides = array<i32>} : memref<1x8x16x128xf32, #tpu.memory_space<vmem>>, vector<1x8x16x128xf32>,
    return
  }
  func.func @transform_0(%arg0: i32, %arg1: i32) -> (i32, i32, i32, i32) {
    %c0_i32 = arith.constant 0 : i32
    %c0_i32_0 = arith.constant 0 : i32
    %c0_i32_1 = arith.constant 0 : i32
    return %arg0, %arg1, %c0_i32, %c0_i32_0 : i32, i32, i32, i32
  }
  func.func @transform_1(%arg0: i32, %arg1: i32) -> (i32, i32, i32, i32) {
    %c8_i32 = arith.constant 8 : i32
    %0 = arith.muli %arg1, %c8_i32 : i32
    %c1_i32 = arith.constant 1 : i32
    %1 = arith.subi %0, %c1_i32 : i32
    %c0_i32 = arith.constant 0 : i32
    %2 = arith.maxsi %1, %c0_i32 : i32
    %c0_i32_0 = arith.constant 0 : i32
    %c0_i32_1 = arith.constant 0 : i32
    %c0_i32_2 = arith.constant 0 : i32
    return %arg0, %2, %c0_i32_0, %c0_i32_1 : i32, i32, i32, i32
  }
  func.func @transform_2(%arg0: i32, %arg1: i32) -> (i32, i32, i32, i32) {
    %c1_i32 = arith.constant 1 : i32
    %0 = arith.addi %arg1, %c1_i32 : i32
    %c8_i32 = arith.constant 8 : i32
    %1 = arith.muli %0, %c8_i32 : i32
    %c15_i32 = arith.constant 15 : i32
    %2 = arith.minsi %1, %c15_i32 : i32
    %c0_i32 = arith.constant 0 : i32
    %c0_i32_0 = arith.constant 0 : i32
    %c0_i32_1 = arith.constant 0 : i32
    return %arg0, %2, %c0_i32, %c0_i32_0 : i32, i32, i32, i32
  }
  func.func @transform_3(%arg0: i32, %arg1: i32) -> (i32, i32) {
    %c0_i32 = arith.constant 0 : i32
    %c0_i32_0 = arith.constant 0 : i32
    %c0_i32_1 = arith.constant 0 : i32
    return %c0_i32, %c0_i32_0 : i32, i32
  }
  func.func @transform_4(%arg0: i32, %arg1: i32) -> (i32, i32) {
    %c0_i32 = arith.constant 0 : i32
    %c0_i32_0 = arith.constant 0 : i32
    %c0_i32_1 = arith.constant 0 : i32
    return %c0_i32, %c0_i32_0 : i32, i32
  }
  func.func @transform_5(%arg0: i32, %arg1: i32) -> (i32, i32) {
    %c0_i32 = arith.constant 0 : i32
    %c0_i32_0 = arith.constant 0 : i32
    %c0_i32_1 = arith.constant 0 : i32
    return %c0_i32, %c0_i32_0 : i32, i32
  }
  func.func @transform_6(%arg0: i32, %arg1: i32) -> (i32, i32) {
    %c0_i32 = arith.constant 0 : i32
    %c0_i32_0 = arith.constant 0 : i32
    %c0_i32_1 = arith.constant 0 : i32
    return %c0_i32, %c0_i32_0 : i32, i32
  }
  func.func @transform_7(%arg0: i32, %arg1: i32) -> (i32, i32) {
    %c0_i32 = arith.constant 0 : i32
    %c0_i32_0 = arith.constant 0 : i32
    %c0_i32_1 = arith.constant 0 : i32
    return %c0_i32, %c0_i32_0 : i32, i32
  }
  func.func @transform_8(%arg0: i32, %arg1: i32) -> (i32, i32) {
    %c0_i32 = arith.constant 0 : i32
    %c0_i32_0 = arith.constant 0 : i32
    %c0_i32_1 = arith.constant 0 : i32
    return %c0_i32, %c0_i32_0 : i32, i32
  }
  func.func @transform_9(%arg0: i32, %arg1: i32) -> (i32, i32) {
    %c0_i32 = arith.constant 0 : i32
    %c0_i32_0 = arith.constant 0 : i32
    %c0_i32_1 = arith.constant 0 : i32
    return %c0_i32, %c0_i32_0 : i32, i32
  }
  func.func @transform_10(%arg0: i32, %arg1: i32) -> (i32, i32) {
    %c0_i32 = arith.constant 0 : i32
    %c0_i32_0 = arith.constant 0 : i32
    %c0_i32_1 = arith.constant 0 : i32
    return %c0_i32, %c0_i32_0 : i32, i32
  }
  func.func @transform_11(%arg0: i32, %arg1: i32) -> (i32, i32, i32, i32) {
    %c0_i32 = arith.constant 0 : i32
    %c0_i32_0 = arith.constant 0 : i32
    %c0_i32_1 = arith.constant 0 : i32
    return %arg0, %arg1, %c0_i32, %c0_i32_0 : i32, i32, i32, i32
  }
}

</mosaic_0001>

<bundles_post_ra>
// kernel: tpu_custom_call.1
= control target key start
LH: loop header
LB: loop body
LE: loop exit
PB: predicated region body
PF: predicated region fallthrough
CT: control target
= control target key end

     0   :  { %s4087_s0 = inlined_call_operand.hbm [shape: f32[2,16,16,128], index: 0, kind: input, shape index: {}]   ;;  %s4088_s1 = inlined_call_operand.hbm [shape: f32[2,16,16,128], index: 1, kind: input, shape index: {}]   ;;  %s4089_s2 = inlined_call_operand.hbm [shape: f32[2,16,16,128], index: 2, kind: input, shape index: {}]   ;;  %s4090_s3 = inlined_call_operand.vmem [shape: f32[1,128], index: 3, kind: input, shape index: {}]   ;;  %s4091_s4 = inlined_call_operand.vmem [shape: f32[1,128], index: 4, kind: input, shape index: {}]   ;;  %s4092_s5 = inlined_call_operand.hbm [shape: f32[128,128], index: 5, kind: input, shape index: {}]   ;;  %s4093_s6 = inlined_call_operand.vmem [shape: f32[1,128], index: 6, kind: input, shape index: {}]   ;;  %s4094_s7 = inlined_call_operand.hbm [shape: f32[384,384], index: 7, kind: input, shape index: {}]   ;;  %s4095_s8 = inlined_call_operand.vmem [shape: f32[1,128], index: 8, kind: input, shape index: {}]   ;;  %s4096_s9 = inlined_call_operand.hbm [shape: f32[128,128], index: 9, kind: input, shape index: {}]   ;;  %s4097_s10 = inlined_call_operand.vmem [shape: f32[1,128], index: 10, kind: input, shape index: {}]   ;;  %s4098_s11 = inlined_call_operand.hbm [shape: f32[2,16,16,128], index: 11, kind: output, shape index: {}]  }
   0x1   :  { %4128 = sst [smem:[#allocation52_spill]] %s4087_s0 }
   0x2   :  { %4129 = sst [smem:[#allocation53_spill]] %s4088_s1 }
   0x3   :  { %4130 = sst [smem:[#allocation54_spill]] %s4089_s2 }
   0x4   :  { %4131 = sst [smem:[#allocation55_spill]] %s4090_s3 }
   0x5   :  { %4132 = sst [smem:[#allocation56_spill]] %s4091_s4 }
   0x6   :  { %4133 = sst [smem:[#allocation57_spill]] %s4092_s5 }
   0x7   :  { %4134 = sst [smem:[#allocation58_spill]] %s4093_s6 }
   0x8   :  { %4135 = sst [smem:[#allocation59_spill]] %s4094_s7 }
   0x9   :  { %4136 = sst [smem:[#allocation60_spill]] %s4095_s8 }
   0xa   :  { %4137 = sst [smem:[#allocation61_spill]] %s4096_s9 }
   0xb   :  { %4138 = sst [smem:[#allocation62_spill]] %s4097_s10 }
   0xc   :  { %4139 = sst [smem:[#allocation63_spill]] %s4098_s11 }
   0xd   :  { %16 = vsyncpa [#allocation4], 0 }
   0xe   :  { %18 = vsyncpa [#allocation4 + $0x1], 0 }
   0xf   :  { %19 = vsyncpa [#allocation7], 0 }
  0x10   :  { %21 = vsyncpa [#allocation7 + $0x1], 0 }
  0x11   :  { %22 = vsyncpa [#allocation10], 0 }
  0x12   :  { %23 = vsyncpa [#allocation13], 0 }
  0x13   :  { %24 = vsyncpa [#allocation5], 0 }
  0x14   :  { %26 = vsyncpa [#allocation5 + $0x1], 0  ;;  %s2955_s17 = smov 0   ;;  %s2957_s18 = smov 0  }
  0x15   :  { %s2959_s19 = smov 0   ;;  %s2961_s20 = smov 0  }
  0x16   :  { %s2963_s21 = smov 0   ;;  %s2965_s22 = smov 0  }
  0x17   :  { %s2967_s23 = smov 0   ;;  %s2969_s24 = smov 0  }
  0x18   :  { %s2971_s25 = smov 0   ;;  %s2973_s26 = smov 0  }
  0x19   :  { %s2975_s27 = smov 0   ;;  %s2977_s28 = smov 0  }
  0x1a   :  { %s2979_s29 = smov 0   ;;  %s2981_s30 = smov 0  }
  0x1b LB: > { %4140 = sst [smem:[#allocation21_spill]] %s2832_s17  ;;  %s3026_s12 = sadd.s32 4294967295, %s2884_s30   ;;  %s2884_s30 = sphi %s2981_s30, %s32_s30   ;;  %s2880_s29 = sphi %s2979_s29, %s4231_s29   ;;  %s2876_s28 = sphi %s2977_s28, %s4230_s28   ;;  %s2872_s27 = sphi %s2975_s27, %s4229_s27   ;;  %s2868_s26 = sphi %s2973_s26, %s4228_s26   ;;  %s2864_s25 = sphi %s2971_s25, %s4227_s25   ;;  %s2860_s24 = sphi %s2969_s24, %s4237_s24   ;;  %s2856_s23 = sphi %s2967_s23, %s4236_s23   ;;  %s2852_s22 = sphi %s2965_s22, %s4225_s22   ;;  %s2848_s21 = sphi %s2963_s21, %s4224_s21   ;;  %s2844_s20 = sphi %s2961_s20, %s4223_s20   ;;  %s2840_s19 = sphi %s2959_s19, %s4235_s19   ;;  %s2836_s18 = sphi %s2957_s18, %s4234_s18   ;;  %s2832_s17 = sphi %s2955_s17, %s4233_s17  }
  0x1c   : > { %4141 = sst [smem:[#allocation22_spill]] %s2836_s18  ;;  %p2256_p0 = scmp.ge.s32.totalorder %s2884_s30, 1 }
  0x1d   : > { %4142 = sst [smem:[#allocation23_spill]] %s2848_s21  ;;  %p67_p1 = scmp.eq.s32.totalorder %s3026_s12, 0 }
  0x1e   : > { %4143 = sst [smem:[#allocation24_spill]] %s2852_s22  ;;  %p345_p2 = scmp.lt.s32.totalorder %s2884_s30, 5 }
  0x1f   : > { %4144 = sst [smem:[#allocation25_spill]] %s2864_s25  ;;  %s2886_s11 = smov [#allocation9]  }
  0x20   : > { %4145 = sst [smem:[#allocation26_spill]] %s2868_s26  ;;  %p3034_p3 = pnand %p2256_p0, %p345_p2 }
  0x21   : > { %4146 = sst [smem:[#allocation27_spill]] %s2872_s27  ;;  %s364_s27 = sshll.u32 %s2886_s11, 4  ;;  %s365_s27 = int_to_ptr.vmem [resolvable:$true] %s364_s27 }
  0x22   : > { %4147 = sst [smem:[#allocation28_spill]] %s2876_s28  ;;  %p2368_p4 = pneg %p3034_p3 }
  0x23   : > { %4148 = sst [smem:[#allocation29_spill]] %s2880_s29  ;;  %s4101_s13 = smov 128  }
  0x24   : > { %s4149_s5 = sld [smem:[#allocation57_spill]]  ;;  %p3042_p5 = pnand %p2368_p4, %p67_p1 }
  0x25   : > { %s4150_s16 = scalar_select %p3034_p3, 1, 0 }
  0x26   : > { %s4103_s14 = smov 8   ;;  %s44_s8 = sadd.s32 1, %s2880_s29 }
  0x27   : > { %4151 = sst [smem:[#allocation30_spill]] %s4150_s16  ;;  %p61_p7 = scmp.eq.s32.totalorder %s2884_s30, 0 }
  0x28   : > { %s2250_s11 = sshll.u32 %s2876_s28, 3  ;;  %p96_p12 = scmp.ne.s32.totalorder %s2852_s22, %s2848_s21 }
  0x29   : > { %s2251_s26 = sadd.s32 4294967295, %s2250_s11  ;;  %p102_p0 = scmp.ne.s32.totalorder %s2848_s21, %s2844_s20 }
  0x2a   : > { %s362_s15 = sshll.u32 %s4149_s5, 4  ;;  %s41_s5 = sadd.s32 1, %s2876_s28  ;;  %s363_s15 = int_to_ptr.hbm [resolvable:$true] %s362_s15 }
  0x2b   : > { %2371 = dma.hbm_to_vmem [thread:$0]  (!%p3042_p5), %s363_s15, 2048, %s365_s27, [#allocation10], %s4101_s13, %s4101_s13, %s4103_s14  }
  0x2c   : > { %p42_p6 = scmp.ge.s32.totalorder %s41_s5, 2  ;;  %p78_p9 = scmp.gt.s32.totalorder %s2251_s26, 0 }
  0x2d   : > { %s89_s15 = sadd.s32 1, %s2852_s22  ;;  %p3076_p13 = por %p96_p12, %p61_p7 }
  0x2e   : > { %s4239_s5 = smov (%p42_p6, %s41_s5), 0  ;;  %s4241_s8 = smov (!%p42_p6, %s44_s8), %s2880_s29 }
  0x2f   : > { %4153 = sst [smem:[#allocation31_spill]] %s4239_s5  ;;  %s49_s6 = ssub.s32 %s2876_s28, %s4239_s5 }
  0x30   : > { %p46_p8 = scmp.ge.s32.totalorder %s4241_s8, 2  ;;  %s2252_s27 = sshll.u32 %s4239_s5, 3 }
  0x31   : > { %s4245_s26 = smov (!%p78_p9, %s2251_s26), 0  ;;  %s2253_s14 = sadd.s32 4294967295, %s2252_s27 }
  0x32   : > { %s4243_s8 = smov (%p46_p8, %s4241_s8), 0  ;;  %p82_p10 = scmp.gt.s32.totalorder %s2253_s14, 0 }
  0x33   : > { %4154 = sst [smem:[#allocation32_spill]] %s4243_s8  ;;  %s3066_s13 = ssub.s32 %s2880_s29, %s4243_s8 }
  0x34   : > { %4155 = sst [smem:[#allocation33_spill]] %s3066_s13  ;;  %s3069_s4 = sor.u32 %s49_s6, %s3066_s13 }
  0x35   : > { %p51_p11 = scmp.eq.s32.totalorder %s3069_s4, 0  ;;  %s4247_s14 = smov (!%p82_p10, %s2253_s14), 0 }
  0x36   : > { %s85_s8 = ssub.s32 %s4245_s26, %s4247_s14  ;;  %s3082_s3 = sadd.s32 8, %s2250_s11 }
  0x37   : > { %4157 = sst [smem:[#allocation34_spill]] %s3082_s3  ;;  %s86_s6 = sor.u32 %s85_s8, %s3066_s13 }
  0x38   : > { %p3087_p2 = por %p102_p0, %p67_p1  ;;  %p87_p4 = scmp.eq.s32.totalorder %s86_s6, 0 }
  0x39   : > { %p114_p6 = scmp.lt.s32.totalorder %s3082_s3, 15  ;;  %s3092_s2 = sadd.s32 8, %s2252_s27 }
  0x3a   : > { %s4158_s16 = scalar_select %p3087_p2, 1, 0 }
  0x3b   : > { %p4119_p8 = scmp.lt.s32.totalorder %s2884_s30, 4  ;;  %s3100_s20 = sshll.u32 %s2880_s29, 5 }
  0x3c   : > { %4159 = sst [smem:[#allocation35_spill]] %s4158_s16  ;;  %s440_s8 = sand.u32 1, %s2884_s30  }
  0x3d   : > { %s3096_s0 = scalar_select %p87_p4, %s2852_s22, %s89_s15  }
  0x3e   : > { %s442_s14 = sand.u32 1, %s2852_s22   ;;  %s2269_s21 = sshll.u32 %s4245_s26, 1 }
  0x3f   : > { %4160 = sst [smem:[#allocation36_spill]] %s3096_s0  ;;  %s2266_s11 = sshll.u32 %s442_s14, 4 }
  0x40   : > { %s453_s13 = sadd.s32 %s2269_s21, %s3100_s20  ;;  %s444_s16 = scalar_lea.vmem [#allocation6], %s2266_s11 }
  0x41   : > { %s458_s6 = sshll.u32 %s444_s16, 4  ;;  %s2271_s17 = sshll.u32 %s453_s13, 3  ;;  %s459_s6 = int_to_ptr.vmem [resolvable:$true] %s458_s6 }
  0x42   : > { %s4161_s1 = sld [smem:[#allocation53_spill]]  ;;  %p2382_p10 = pnand %p4119_p8, %p3076_p13 }
  0x43   : > { %s4162_s7 = sld [smem:[#allocation59_spill]]  ;;  %s3115_s21 = scalar_lea.sflag [#allocation7], %s440_s8 }
  0x44   : > { %s4163_s26 = smov 8   ;;  %s4164_s16 = smov 128  }
  0x45   : > { %s2890_s5 = smov 384   ;;  %s4165_s9 = sld [smem:[#allocation61_spill]] }
  0x46   : > { %s2892_s8 = smov [#allocation12]   ;;  %s2249_s11 = sadd.s32 4294967294, %s2884_s30  }
  0x47   : > { %s398_s14 = sshll.u32 %s2892_s8, 4  ;;  %p60_p12 = scmp.ne.s32.totalorder %s2864_s25, %s2860_s24  ;;  %s399_s14 = int_to_ptr.vmem [resolvable:$true] %s398_s14 }
  0x48   : > { %s455_s3 = scalar_lea.hbm %s4161_s1, %s2271_s17  ;;  %s2891_s17 = smov 24  }
  0x49   : > { %s456_s15 = sshll.u32 %s455_s3, 4  ;;  %s379_s22 = sshll.u32 %s4162_s7, 4  ;;  %s457_s15 = int_to_ptr.hbm [resolvable:$true] %s456_s15  ;;  %s380_s22 = int_to_ptr.hbm [resolvable:$true] %s379_s22 }
  0x4a   : > { %2384 = dma.hbm_to_vmem [thread:$0]  (!%p2382_p10), %s457_s15, 256, %s459_s6, %s3115_s21, %s4164_s16, %s4164_s16, %s4163_s26  }
  0x4b   : > { %s2889_s3 = smov [#allocation11]   ;;  %s396_s13 = sshll.u32 %s4165_s9, 4  ;;  %s397_s13 = int_to_ptr.hbm [resolvable:$true] %s396_s13 }
  0x4c   : > { %s381_s0 = sshll.u32 %s2889_s3, 4  ;;  %s53_s6 = sadd.s32 1, %s2864_s25  ;;  %s382_s0 = int_to_ptr.vmem [resolvable:$true] %s381_s0 }
  0x4d   : > { %2374 = dma.hbm_to_vmem [thread:$0]  (!%p3042_p5), %s380_s22, 18432, %s382_s0, [#allocation10], %s2890_s5, %s2890_s5, %s2891_s17  }
  0x4e   : > { %2377 = dma.hbm_to_vmem [thread:$0]  (!%p3042_p5), %s397_s13, 2048, %s399_s14, [#allocation13], %s4164_s16, %s4164_s16, %s4163_s26  }
  0x4f   : > { %s3138_s22 = scalar_select %p51_p11, %s2864_s25, %s53_s6  }
  0x50   : > { %p3142_p13 = por %p61_p7, %p60_p12  ;;  %p66_p0 = scmp.ne.s32.totalorder %s2860_s24, %s2856_s23 }
  0x51   : > { %4166 = sst [smem:[#allocation37_spill]] %s3138_s22  ;;  %p332_p4 = scmp.eq.s32.totalorder %s3026_s12, 3 }
  0x52   : > { %p338_p10 = scmp.eq.s32.totalorder %s2249_s11, 3  ;;  %p3151_p9 = por %p67_p1, %p66_p0 }
  0x53   : > { %s415_s15 = sand.u32 1, %s2864_s25   ;;  %p3156_p5 = por %p332_p4, %p60_p12 }
  0x54   : > { %s4170_s3 = sld [smem:[#allocation34_spill]]  ;;  %p3160_p11 = por %p338_p10, %p66_p0 }
  0x55   : > { %s2261_s5 = sshll.u32 %s415_s15, 7  ;;  %s4172_s17 = sld [smem:[#allocation22_spill]] }
  0x56   : > { %s2296_s18 = sshll.u32 %s2876_s28, 4  ;;  %s4173_s29 = sld [smem:[#allocation21_spill]] }
  0x57   : > { %s425_s13 = sadd.s32 %s2296_s18, %s3100_s20  ;;  %s419_s8 = scalar_lea.vmem [#allocation3], %s2261_s5 }
  0x58   : > { %s430_s14 = sshll.u32 %s419_s8, 4  ;;  %s4174_s11 = sld [smem:[#allocation33_spill]]  ;;  %s431_s14 = int_to_ptr.vmem [resolvable:$true] %s430_s14 }
  0x59   : > { %s2265_s6 = sshll.u32 %s425_s13, 3  ;;  %s4175_s9 = sld [smem:[#allocation52_spill]] }
  0x5a   : > { %p2379_p12 = pnand %p4119_p8, %p3142_p13  ;;  %s416_s28 = scalar_lea.sflag [#allocation4], %s415_s15 }
  0x5b   : > { %s125_s5 = sadd.s32 1, %s2840_s19  ;;  %s4249_s3 = smov (!%p114_p6, %s4170_s3), 15 }
  0x5c   : > { %p4176_p0 = scmp.lt.s32.totalorder %s3092_s2, 15  ;;  %p132_p4 = scmp.ne.s32.totalorder %s2840_s19, %s4172_s17 }
  0x5d   : > { %p138_p10 = scmp.ne.s32.totalorder %s4172_s17, %s4173_s29  ;;  %s470_s7 = sand.u32 1, %s2840_s19  }
  0x5e   : > { %s4251_s2 = smov (!%p4176_p0, %s3092_s2), 15  ;;  %p3191_p13 = por %p132_p4, %p61_p7 }
  0x5f   : > { %s427_s22 = scalar_lea.hbm %s4175_s9, %s2265_s6  ;;  %s121_s1 = ssub.s32 %s4249_s3, %s4251_s2 }
  0x60   : > { %s428_s25 = sshll.u32 %s427_s22, 4  ;;  %s122_s9 = sor.u32 %s121_s1, %s4174_s11  ;;  %s429_s25 = int_to_ptr.hbm [resolvable:$true] %s428_s25 }
  0x61   : > { %2381 = dma.hbm_to_vmem [thread:$0]  (!%p2379_p12), %s429_s25, 2048, %s431_s14, %s416_s28, %s4164_s16, %s4164_s16, %s4163_s26  }
  0x62   : > { %p123_p8 = scmp.eq.s32.totalorder %s122_s9, 0  ;;  %p3197_p12 = por %p138_p10, %p67_p1 }
  0x63   : > { %s2272_s28 = sshll.u32 %s470_s7, 4  ;;  %s2274_s27 = sshll.u32 %s4249_s3, 1 }
  0x64   : > { %s3202_s15 = scalar_select %p123_p8, %s2840_s19, %s125_s5  }
  0x65   : > { %s481_s2 = sadd.s32 %s2274_s27, %s3100_s20  ;;  %s472_s18 = scalar_lea.vmem [#allocation8], %s2272_s28 }
  0x66   : > { %s2276_s17 = sshll.u32 %s481_s2, 3  ;;  %s486_s29 = sshll.u32 %s472_s18, 4  ;;  %s487_s29 = int_to_ptr.vmem [resolvable:$true] %s486_s29 }
  0x67   : > { %s4179_s14 = sld [smem:[#allocation54_spill]]  ;;  %p4180_p7 = scmp.lt.s32.totalorder %s2884_s30, 4 }
  0x69   : > { %p2385_p6 = pnand %p4180_p7, %p3191_p13 }
  0x6b   : > { %498 = sbr.rel (%p3034_p3) target bundleno = 1099 (0x44b), region = 64 }
  0x6d   : > { %s483_s11 = scalar_lea.hbm %s4179_s14, %s2276_s17 }
  0x6e   : > { %s484_s6 = sshll.u32 %s483_s11, 4  ;;  %s485_s6 = int_to_ptr.hbm [resolvable:$true] %s484_s6 }
  0x6f   : > { %2387 = dma.hbm_to_vmem [thread:$0]  (!%p2385_p6), %s485_s6, 256, %s487_s29, %s3115_s21, %s4164_s16, %s4164_s16, %s4163_s26  }
  0x70   : > { %s3219_s20 = sand.u32 1, %s2860_s24  }
  0x71   : > { %s2278_s5 = sshll.u32 %s3219_s20, 7  ;;  %s501_s1 = scalar_lea.sflag [#allocation4], %s3219_s20 }
  0x72   : > { %s3225_s7 = scalar_lea.vmem [#allocation3], %s2278_s5 }
  0x73   : > { %2807 = dma.done.wait (%p3151_p9), %s501_s1, 2048  }
  0x74   : > { %2809 = vsyncadd (%p3151_p9), %s501_s1, 4294965248  ;;  %s4182_s21 = sld [smem:[#allocation23_spill]]  ;;  %s510_s16 = sand.u32 1, %s3026_s12  }
  0x75   : > { %s511_s28 = scalar_lea.sflag [#allocation7], %s510_s16 }
  0x7a   : > { %s512_s9 = sand.u32 1, %s4182_s21  }
  0x7b   : > { %s3233_s22 = sshll.u32 %s512_s9, 4 }
  0x7c   : > { %s514_s27 = scalar_lea.vmem [#allocation6], %s3233_s22 }
  0x7d   : > { %2811 = dma.done.wait (%p3087_p2), %s511_s28, 256  }
  0x7e   : > { %2813 = vsyncadd (%p3087_p2), %s511_s28, 4294967040  ;;  %s4184_s2 = sld [smem:[#allocation22_spill]] }
  0x84   : > { %s522_s17 = sand.u32 1, %s4184_s2  }
  0x85   : > { %s3241_s10 = sshll.u32 %s522_s17, 4 }
  0x86   : > { %s524_s18 = scalar_lea.vmem [#allocation8], %s3241_s10 }
  0x87   : > { %2815 = dma.done.wait (%p3197_p12), %s511_s28, 256  }
  0x88   : > { %2817 = vsyncadd (%p3197_p12), %s511_s28, 4294967040 }
  0x89   : > { %2819 = dma.done.wait (%p67_p1), [#allocation10], 20480  }
  0x8a   : > { %2821 = vsyncadd (%p67_p1), [#allocation10], 4294946816 }
  0x8b   : > { %2823 = dma.done.wait (%p67_p1), [#allocation13], 2048  }
  0x8c   : > { %2825 = vsyncadd (%p67_p1), [#allocation13], 4294965248  ;;  %v691_v0 = vld [vmem:[#allocation9 + $0x78] sm:$0xff]  ;;  %v690_v1 = vld [vmem:[#allocation9 + $0x70] sm:$0xff]  ;;  %s4185_s29 = sld [smem:[#allocation55_spill]]  ;;  %vm1726_vm0 = vcmask 1040384  }
  0x8d   : > { %695 = vmatpush.msra.mxu0 %v691_v0  ;;  %830 = vmatpush.msra.mxu1 %v691_v0  ;;  %v689_v2 = vld [vmem:[#allocation9 + $0x68] sm:$0xff]  ;;  %v688_v3 = vld [vmem:[#allocation9 + $0x60] sm:$0xff]  ;;  %v687_v4 = vld [vmem:[#allocation9 + $0x58] sm:$0xff]  ;;  %s4186_s14 = sld [smem:[#allocation56_spill]]  ;;  %vm1790_vm2 = vcmask 1046528   ;;  %s3970_s17 = scalar_lea.vmem [#allocation14], %s2278_s5 }
  0x8e   : > { %898 = vmatpush.msra.mxu2 %v691_v0  ;;  %v686_v5 = vld [vmem:[#allocation9 + $0x50] sm:$0xff]  ;;  %v685_v6 = vld [vmem:[#allocation9 + $0x48] sm:$0xff]  ;;  %v684_v7 = vld [vmem:[#allocation9 + $0x40] sm:$0xff]  ;;  %s4187_s11 = sld [smem:[#allocation26_spill]]  ;;  %s2077_s6 = sshll.u32 %s3970_s17, 4  ;;  %s2078_s6 = int_to_ptr.vmem [resolvable:$true] %s2077_s6 }
  0x8f   : > { %696 = vmatpush.msra.mxu0 %v690_v1  ;;  %831 = vmatpush.msra.mxu1 %v690_v1  ;;  %v683_v8 = vld [vmem:[#allocation9 + $0x38] sm:$0xff]  ;;  %v682_v9 = vld [vmem:[#allocation9 + $0x30] sm:$0xff]  ;;  %v606_v11 = vld [vmem:[%s3225_s7] sm:$0xff]  ;;  %s4188_s1 = sld [smem:[#allocation58_spill]]  ;;  %s2062_s3 = scalar_lea.sflag [#allocation5], %s3219_s20 }
  0x90   : > { %899 = vmatpush.msra.mxu2 %v690_v1  ;;  %v806_v12 = vld [vmem:[%s514_s27] sm:$0xff]  ;;  %v681_v13 = vld [vmem:[#allocation9 + $0x28] sm:$0xff]  ;;  %v679_v18 = vld [vmem:[#allocation9 + $0x18] sm:$0xff]  ;;  %s4217_s22 = sld [smem:[#allocation60_spill]] }
  0x91   : > { %697 = vmatpush.msra.mxu0 %v689_v2  ;;  %832 = vmatpush.msra.mxu1 %v689_v2  ;;  %v680_v14 = vld [vmem:[#allocation9 + $0x20] sm:$0xff]  ;;  %v678_v19 = vld [vmem:[#allocation9 + $0x10] sm:$0xff]  ;;  %v607_v22 = vld [vmem:[%s3225_s7 + $0x8] sm:$0xff]  ;;  %s4218_s2 = sld [smem:[#allocation62_spill]] }
  0x92   : > { %900 = vmatpush.msra.mxu2 %v689_v2  ;;  %v3259_v10 = vld [vmem:[%s4185_s29] ss:$0 sm:$0xff]  ;;  %v807_v23 = vld [vmem:[%s514_s27 + $0x8] sm:$0xff]  ;;  %v608_v32 = vld [vmem:[%s3225_s7 + $0x10] sm:$0xff]  ;;  %s4219_s5 = sld [smem:[#allocation27_spill]] }
  0x93   : > { %698 = vmatpush.msra.mxu0 %v688_v3  ;;  %833 = vmatpush.msra.mxu1 %v688_v3  ;;  %v625_v15 = vmul.f32 %v3259_v10, %v606_v11  ;;  %v3268_v16 = vld [vmem:[%s4186_s14] ss:$0 sm:$0xff]  ;;  %v808_v17 = vmul.f32 %v3259_v10, %v806_v12  ;;  %v677_v24 = vld [vmem:[#allocation9 + $0x8] sm:$0xff]  ;;  %v626_v28 = vmul.f32 %v3259_v10, %v607_v22  ;;  %v609_v37 = vld [vmem:[%s3225_s7 + $0x18] sm:$0xff]  ;;  %s4220_s8 = sld [smem:[#allocation63_spill]] }
  0x94   : > { %901 = vmatpush.msra.mxu2 %v688_v3  ;;  %v676_v25 = vld [vmem:[#allocation9] sm:$0xff]  ;;  %v809_v29 = vmul.f32 %v3259_v10, %v807_v23  ;;  %v627_v35 = vmul.f32 %v3259_v10, %v608_v32  ;;  %v628_v39 = vmul.f32 %v3259_v10, %v609_v37  ;;  %v611_v45 = vld [vmem:[%s3225_s7 + $0x28] sm:$0xff]  ;;  %v612_v49 = vld [vmem:[%s3225_s7 + $0x30] sm:$0xff]  ;;  %p602_p1 = scmp.gt.s32.totalorder %s4187_s11, 0  ;;  %p604_p3 = scmp.lt.s32.totalorder %s4187_s11, 1 }
  0x95   : > { %699 = vmatpush.msra.mxu0 %v687_v4  ;;  %834 = vmatpush.msra.mxu1 %v687_v4  ;;  %v644_v20 = vadd.f32 %v3268_v16, %v625_v15  ;;  %v810_v21 = vadd.f32 %v3268_v16, %v808_v17  ;;  %v645_v30 = vadd.f32 %v3268_v16, %v626_v28  ;;  %v610_v41 = vld [vmem:[%s3225_s7 + $0x20] sm:$0xff]  ;;  %v613_v53 = vld [vmem:[%s3225_s7 + $0x38] sm:$0xff]  ;;  %v615_v61 = vld [vmem:[%s3225_s7 + $0x48] sm:$0xff]  ;;  %s2299_s10 = sshll.u32 %s4187_s11, 4 }
  0x96   : > { %902 = vmatpush.msra.mxu2 %v687_v4  ;;  %v811_v31 = vadd.f32 %v3268_v16, %v809_v29  ;;  %v646_v36 = vadd.f32 %v3268_v16, %v627_v35  ;;  %v647_v40 = vadd.f32 %v3268_v16, %v628_v39  ;;  %v629_v43 = vmul.f32 %v3259_v10, %v610_v41  ;;  %v614_v57 = vld [vmem:[%s3225_s7 + $0x40] sm:$0xff]  ;;  %v1069_v1 = vld [vmem:[#allocation11 + $0x2e8] sm:$0xff]  ;;  %v1066_v3 = vld [vmem:[#allocation11 + $0x2d0] sm:$0xff]  ;;  %s603_s21 = scalar_select %p602_p1, 1.0, 0.0 }
  0x97   : > { %700 = vmatpush.msra.mxu0 %v686_v5  ;;  %835 = vmatpush.msra.mxu1 %v686_v5  ;;  %v660_v26 = vmax.f32 %v644_v20, 0.0  ;;  %v812_v27 = vmax.f32 %v810_v21, 0.0  ;;  %v661_v33 = vmax.f32 %v645_v30, 0.0  ;;  %v630_v47 = vmul.f32 %v3259_v10, %v611_v45  ;;  %v1021_v2 = vld [vmem:[#allocation11 + $0x168] sm:$0xff]  ;;  %v616_v4 = vld [vmem:[%s3225_s7 + $0x50] sm:$0xff]  ;;  %v617_v12 = vld [vmem:[%s3225_s7 + $0x58] sm:$0xff] }
  0x98   : > { %903 = vmatpush.msra.mxu2 %v686_v5  ;;  %v813_v34 = vmax.f32 %v811_v31, 0.0  ;;  %v662_v38 = vmax.f32 %v646_v36, 0.0  ;;  %v663_v42 = vmax.f32 %v647_v40, 0.0  ;;  %v648_v44 = vadd.f32 %v3268_v16, %v629_v43  ;;  %1120 = vmatpush.msra.mxu3 %v1021_v2  ;;  %v1022_v5 = vld [vmem:[#allocation11 + $0x170] sm:$0xff]  ;;  %v1060_v15 = vld [vmem:[#allocation11 + $0x2a0] sm:$0xff]  ;;  %v1013_v20 = vld [vmem:[#allocation11 + $0x128] sm:$0xff] }
  0x99   : > { %701 = vmatpush.msra.mxu0 %v685_v6  ;;  %836 = vmatpush.msra.mxu1 %v685_v6  ;;  %v649_v48 = vadd.f32 %v3268_v16, %v630_v47  ;;  %v631_v51 = vmul.f32 %v3259_v10, %v612_v49  ;;  %v632_v55 = vmul.f32 %v3259_v10, %v613_v53  ;;  %v1016_v17 = vld [vmem:[#allocation11 + $0x140] sm:$0xff]  ;;  %v1009_v21 = vld [vmem:[#allocation11 + $0x108] sm:$0xff]  ;;  %v1054_v22 = vld [vmem:[#allocation11 + $0x270] sm:$0xff]  ;;  %s605_s26 = scalar_select %p604_p3, 1.0, 0.0 }
  0x9a   : > { %904 = vmatpush.msra.mxu2 %v685_v6  ;;  %v664_v46 = vmax.f32 %v648_v44, 0.0  ;;  %v633_v59 = vmul.f32 %v3259_v10, %v614_v57  ;;  %v634_v63 = vmul.f32 %v3259_v10, %v615_v61  ;;  %v1018_v6 = vld [vmem:[#allocation11 + $0x150] sm:$0xff]  ;;  %v635_v11 = vmul.f32 %v3259_v10, %v616_v4  ;;  %v1007_v28 = vld [vmem:[#allocation11 + $0xf8] sm:$0xff]  ;;  %v1048_v31 = vld [vmem:[#allocation11 + $0x240] sm:$0xff]  ;;  %s2742_s9 = scalar_lea.hbm %s4220_s8, 512 }
  0x9b   : > { %702 = vmatpush.msra.mxu0 %v684_v7  ;;  %837 = vmatpush.msra.mxu1 %v684_v7  ;;  %v665_v50 = vmax.f32 %v649_v48, 0.0  ;;  %v650_v52 = vadd.f32 %v3268_v16, %v631_v51  ;;  %v651_v56 = vadd.f32 %v3268_v16, %v632_v55  ;;  %v1010_v23 = vld [vmem:[#allocation11 + $0x110] sm:$0xff]  ;;  %v1003_v30 = vld [vmem:[#allocation11 + $0xd8] sm:$0xff]  ;;  %v1004_v32 = vld [vmem:[#allocation11 + $0xe0] sm:$0xff] }
  0x9c   : > { %905 = vmatpush.msra.mxu2 %v684_v7  ;;  %v652_v60 = vadd.f32 %v3268_v16, %v633_v59  ;;  %v653_v0 = vadd.f32 %v3268_v16, %v634_v63  ;;  %v1063_v7 = vld [vmem:[#allocation11 + $0x2b8] sm:$0xff]  ;;  %1121 = vmatpush.msra.mxu3 %v1018_v6  ;;  %v1045_v35 = vld [vmem:[#allocation11 + $0x228] sm:$0xff]  ;;  %v998_v41 = vld [vmem:[#allocation11 + $0xb0] sm:$0xff] }
  0x9d   : > { %703 = vmatpush.msra.mxu0 %v683_v8  ;;  %838 = vmatpush.msra.mxu1 %v683_v8  ;;  %v666_v54 = vmax.f32 %v650_v52, 0.0  ;;  %v667_v58 = vmax.f32 %v651_v56, 0.0  ;;  %v1001_v36 = vld [vmem:[#allocation11 + $0xc8] sm:$0xff]  ;;  %v1039_v43 = vld [vmem:[#allocation11 + $0x1f8] sm:$0xff]  ;;  %v1036_v47 = vld [vmem:[#allocation11 + $0x1e0] sm:$0xff] }
  0x9e   : > { %906 = vmatpush.msra.mxu2 %v683_v8  ;;  %v668_v62 = vmax.f32 %v652_v60, 0.0  ;;  %v1019_v8 = vld [vmem:[#allocation11 + $0x158] sm:$0xff]  ;;  %v997_v37 = vld [vmem:[#allocation11 + $0xa8] sm:$0xff]  ;;  %v992_v48 = vld [vmem:[#allocation11 + $0x80] sm:$0xff] }
  0x9f   : > { %704 = vmatpush.msra.mxu0 %v682_v9  ;;  %839 = vmatpush.msra.mxu1 %v682_v9  ;;  %v995_v44 = vld [vmem:[#allocation11 + $0x98] sm:$0xff]  ;;  %v619_v49 = vld [vmem:[%s3225_s7 + $0x68] sm:$0xff]  ;;  %v1030_v56 = vld [vmem:[#allocation11 + $0x1b0] sm:$0xff] }
  0xa0   : > { %907 = vmatpush.msra.mxu2 %v682_v9  ;;  %v669_v9 = vmax.f32 %v653_v0, 0.0  ;;  %v1033_v51 = vld [vmem:[#allocation11 + $0x1c8] sm:$0xff]  ;;  %v986_v57 = vld [vmem:[#allocation11 + $0x50] sm:$0xff]  ;;  %v1027_v59 = vld [vmem:[#allocation11 + $0x198] sm:$0xff] }
  0xa1   : > { %705 = vmatpush.msra.mxu0 %v681_v13  ;;  %840 = vmatpush.msra.mxu1 %v681_v13  ;;  %v989_v52 = vld [vmem:[#allocation11 + $0x68] sm:$0xff]  ;;  %v983_v60 = vld [vmem:[#allocation11 + $0x38] sm:$0xff]  ;;  %v1024_v63 = vld [vmem:[#allocation11 + $0x180] sm:$0xff] }
  0xa2   : > { %908 = vmatpush.msra.mxu2 %v681_v13  ;;  %v654_v13 = vadd.f32 %v3268_v16, %v635_v11  ;;  %v985_v55 = vld [vmem:[#allocation11 + $0x48] sm:$0xff]  ;;  %v980_v0 = vld [vmem:[#allocation11 + $0x20] sm:$0xff] }
  0xa3   : > { %706 = vmatpush.msra.mxu0 %v680_v14  ;;  %841 = vmatpush.msra.mxu1 %v680_v14  ;;  %v976_v2 = vld [vmem:[#allocation11] sm:$0xff] }
  0xa4   : > { %909 = vmatpush.msra.mxu2 %v680_v14  ;;  %v1015_v14 = vld [vmem:[#allocation11 + $0x138] sm:$0xff] }
  0xa5   : > { %707 = vmatpush.msra.mxu0 %v679_v18  ;;  %842 = vmatpush.msra.mxu1 %v679_v18 }
  0xa6   : > { %910 = vmatpush.msra.mxu2 %v679_v18  ;;  %1122 = vmatpush.msra.mxu3 %v1015_v14  ;;  %v1012_v18 = vld [vmem:[#allocation11 + $0x120] sm:$0xff] }
  0xa7   : > { %708 = vmatpush.msra.mxu0 %v678_v19  ;;  %843 = vmatpush.msra.mxu1 %v678_v19 }
  0xa8   : > { %911 = vmatpush.msra.mxu2 %v678_v19  ;;  %v1057_v19 = vld [vmem:[#allocation11 + $0x288] sm:$0xff]  ;;  %1123 = vmatpush.msra.mxu3 %v1012_v18 }
  0xa9   : > { %709 = vmatpush.msra.mxu0 %v677_v24  ;;  %844 = vmatpush.msra.mxu1 %v677_v24 }
  0xaa   : > { %912 = vmatpush.msra.mxu2 %v677_v24  ;;  %v670_v24 = vmax.f32 %v654_v13, 0.0  ;;  %1124 = vmatpush.msra.mxu3 %v1009_v21  ;;  %v3326_v13 = vld [vmem:[%s4188_s1] ss:$0 sm:$0xff] }
  0xab   : > { %710 = vmatpush.msra.mxu0 %v676_v25  ;;  %845 = vmatpush.msra.mxu1 %v676_v25 }
  0xac   : > { %711 = vmatmul.f32.vlgmr.msra.gmra.mxu0 %v660_v26  ;;  %846 = vmatmul.f32.vlgmr.msra.gmra.mxu1 %v812_v27  ;;  %v1006_v26 = vld [vmem:[#allocation11 + $0xf0] sm:$0xff]  ;;  %v1051_v27 = vld [vmem:[#allocation11 + $0x258] sm:$0xff] }
  0xad   : > { %913 = vmatpush.msra.mxu2 %v676_v25  ;;  %1185 = vmatpush.msrb.mxu1 %v1069_v1  ;;  %v636_v25 = vmul.f32 %v3259_v10, %v617_v12 }
  0xae   : > { %1315 = vmatpush.msrb.mxu0 %v1022_v5  ;;  %1125 = vmatpush.msra.mxu3 %v1006_v26 }
  0xaf   : > { %2300 = vmatpush.msrb.mxu2 %v1069_v1  ;;  %1186 = vmatpush.msrb.mxu1 %v1066_v3  ;;  %v655_v29 = vadd.f32 %v3268_v16, %v636_v25  ;;  %v620_v1 = vld [vmem:[%s3225_s7 + $0x70] sm:$0xff] }
  0xb0   : > { %1316 = vmatpush.msrb.mxu0 %v1019_v8  ;;  %1126 = vmatpush.msra.mxu3 %v1003_v30  ;;  %v639_v5 = vmul.f32 %v3259_v10, %v620_v1 }
  0xb1   : > { %2301 = vmatpush.msrb.mxu2 %v1066_v3  ;;  %1187 = vmatpush.msrb.mxu1 %v1063_v7  ;;  %v671_v39 = vmax.f32 %v655_v29, 0.0  ;;  %v977_v3 = vld [vmem:[#allocation11 + $0x8] sm:$0xff] }
  0xb2   : > { %1317 = vmatpush.msrb.mxu0 %v1016_v17  ;;  %v658_v6 = vadd.f32 %v3268_v16, %v639_v5 }
  0xb3   : > { %2302 = vmatpush.msrb.mxu2 %v1063_v7  ;;  %1188 = vmatpush.msrb.mxu1 %v1060_v15  ;;  %v621_v7 = vld [vmem:[%s3225_s7 + $0x78] sm:$0xff] }
  0xb4   : > { %714 = vmatmul.f32.gmra.mxu0 %v661_v33  ;;  %849 = vmatmul.f32.gmra.mxu1 %v813_v34  ;;  %v618_v33 = vld [vmem:[%s3225_s7 + $0x60] sm:$0xff]  ;;  %v674_v8 = vmax.f32 %v658_v6, 0.0 }
  0xb5   : > { %2303 = vmatpush.msrb.mxu2 %v1060_v15  ;;  %1189 = vmatpush.msrb.mxu1 %v1057_v19  ;;  %v1000_v34 = vld [vmem:[#allocation11 + $0xc0] sm:$0xff]  ;;  %v637_v40 = vmul.f32 %v3259_v10, %v618_v33  ;;  %v1118_v33 = vld [vmem:[#allocation11 + $0x470] sm:$0xff] }
  0xb6   : > { %1318 = vmatpush.msrb.mxu0 %v1013_v20  ;;  %1127 = vmatpush.msra.mxu3 %v1000_v34  ;;  %v1115_v34 = vld [vmem:[#allocation11 + $0x458] sm:$0xff] }
  0xb7   : > { %2304 = vmatpush.msrb.mxu2 %v1057_v19  ;;  %1190 = vmatpush.msrb.mxu1 %v1054_v22  ;;  %v656_v45 = vadd.f32 %v3268_v16, %v637_v40  ;;  %v855_v19 = vstv %s603_s21  ;;  %v1106_v40 = vld [vmem:[#allocation11 + $0x410] sm:$0xff] }
  0xb8   : > { %1319 = vmatpush.msrb.mxu0 %v1010_v23  ;;  %1128 = vmatpush.msra.mxu3 %v997_v37  ;;  %v1112_v37 = vld [vmem:[#allocation11 + $0x440] sm:$0xff] }
  0xb9   : > { %2305 = vmatpush.msrb.mxu2 %v1054_v22  ;;  %1191 = vmatpush.msrb.mxu1 %v1051_v27  ;;  %v672_v53 = vmax.f32 %v656_v45, 0.0 }
  0xba   : > { %1320 = vmatpush.msrb.mxu0 %v1007_v28 }
  0xbb   : > { %2306 = vmatpush.msrb.mxu2 %v1051_v27  ;;  %1192 = vmatpush.msrb.mxu1 %v1048_v31 }
  0xbc   : > { %717 = vmatmul.f32.gmra.mxu0 %v662_v38  ;;  %v1042_v38 = vld [vmem:[#allocation11 + $0x210] sm:$0xff] }
  0xbd   : > { %2307 = vmatpush.msrb.mxu2 %v1048_v31  ;;  %1321 = vmatpush.msrb.mxu0 %v1004_v32 }
  0xbe   : > { %1193 = vmatpush.msrb.mxu1 %v1045_v35 }
  0xbf   : > { %2308 = vmatpush.msrb.mxu2 %v1045_v35  ;;  %1322 = vmatpush.msrb.mxu0 %v1001_v36 }
  0xc0   : > { %1194 = vmatpush.msrb.mxu1 %v1042_v38 }
  0xc1   : > { %2309 = vmatpush.msrb.mxu2 %v1042_v38  ;;  %1323 = vmatpush.msrb.mxu0 %v998_v41  ;;  %v874_v41 = vld [vmem:[%s524_s18] sm:$0xff] }
  0xc2   : > { %1195 = vmatpush.msrb.mxu1 %v1039_v43 }
  0xc3   : > { %1324 = vmatpush.msrb.mxu0 %v995_v44  ;;  %2310 = vmatpush.msrb.mxu2 %v1039_v43  ;;  %v876_v43 = vmul.f32 %v3259_v10, %v874_v41 }
  0xc4   : > { %720 = vmatmul.f32.gmra.mxu0 %v663_v42  ;;  %v994_v42 = vld [vmem:[#allocation11 + $0x90] sm:$0xff]  ;;  %1196 = vmatpush.msrb.mxu1 %v1036_v47 }
  0xc5   : > { %1129 = vmatpush.msra.mxu3 %v994_v42  ;;  %1325 = vmatpush.msrb.mxu0 %v992_v48  ;;  %v1103_v42 = vld [vmem:[#allocation11 + $0x3f8] sm:$0xff] }
  0xc6   : > { %1197 = vmatpush.msrb.mxu1 %v1033_v51  ;;  %2311 = vmatpush.msrb.mxu2 %v1036_v47  ;;  %v878_v47 = vadd.f32 %v3268_v16, %v876_v43  ;;  %v3417_v43 = vld [vmem:[#allocation11 + $0x280] sm:$0xff] }
  0xc7   : > { %1326 = vmatpush.msrb.mxu0 %v989_v52  ;;  %v875_v52 = vld [vmem:[%s524_s18 + $0x8] sm:$0xff]  ;;  %s2288_s18 = sshll.u32 %s4219_s5, 5 }
  0xc8   : > { %1198 = vmatpush.msrb.mxu1 %v1030_v56  ;;  %2312 = vmatpush.msrb.mxu2 %v1033_v51  ;;  %v1094_v51 = vld [vmem:[#allocation11 + $0x3b0] sm:$0xff]  ;;  %s2074_s12 = sadd.s32 %s2299_s10, %s2288_s18 }
  0xc9   : > { %1327 = vmatpush.msrb.mxu0 %v986_v57  ;;  %v1088_v57 = vld [vmem:[#allocation11 + $0x380] sm:$0xff]  ;;  %s2289_s25 = sshll.u32 %s2074_s12, 3 }
  0xca   : > { %1199 = vmatpush.msrb.mxu1 %v1027_v59  ;;  %2313 = vmatpush.msrb.mxu2 %v1030_v56  ;;  %s2076_s14 = scalar_lea.hbm %s4220_s8, %s2289_s25 }
  0xcb   : > { %1328 = vmatpush.msrb.mxu0 %v983_v60  ;;  %v1085_v60 = vld [vmem:[#allocation11 + $0x368] sm:$0xff]  ;;  %s2079_s11 = sshll.u32 %s2076_s14, 4  ;;  %s2080_s11 = int_to_ptr.hbm [resolvable:$true] %s2079_s11 }
  0xcc   : > { %723 = vmatmul.f32.gmra.mxu0 %v664_v46  ;;  %v991_v46 = vld [vmem:[#allocation11 + $0x78] sm:$0xff]  ;;  %1200 = vmatpush.msrb.mxu1 %v1024_v63  ;;  %s2736_s1 = sshra.s32 %s2080_s11, 4  ;;  %s2737_s1 = int_to_ptr.hbm [resolvable:$true] %s2736_s1 }
  0xcd   : > { %1130 = vmatpush.msra.mxu3 %v991_v46  ;;  %1329 = vmatpush.msrb.mxu0 %v980_v0  ;;  %v1100_v46 = vld [vmem:[#allocation11 + $0x3e0] sm:$0xff]  ;;  %s2738_s21 = scalar_lea.hbm %s2737_s1, 128  ;;  %p2743_p0 = scmp.lt.s32.totalorder %s2737_s1, %s4220_s8 }
  0xce   : > { %2314 = vmatpush.msrb.mxu2 %v1027_v59  ;;  %1445 = vmatpush.msra.mxu1 %v1118_v33  ;;  %v1076_v0 = vld [vmem:[#allocation11 + $0x320] sm:$0xff]  ;;  %v3405_v33 = vld [vmem:[#allocation11 + $0x2c8] sm:$0xff]  ;;  %p2739_p2 = scmp.ne.s32.totalorder %s2737_s1, %s2738_s21  ;;  %p2744_p4 = scmp.lt.s32.totalorder %s2742_s9, %s2738_s21 }
  0xcf   : > { %1330 = vmatpush.msrb.mxu0 %v977_v3  ;;  %v1117_v3 = vld [vmem:[#allocation11 + $0x468] sm:$0xff] }
  0xd0   : > { %2315 = vmatpush.msrb.mxu2 %v1024_v63  ;;  %1446 = vmatpush.msra.mxu1 %v1115_v34  ;;  %v1093_v34 = vld [vmem:[#allocation11 + $0x3a8] sm:$0xff]  ;;  %p2740_p8 = pnand %p2739_p2, %p3156_p5  ;;  %p2745_p10 = por %p2744_p4, %p2743_p0 }
  0xd2   : > { %1447 = vmatpush.msra.mxu1 %v1112_v37  ;;  %v1058_v37 = vld [vmem:[#allocation11 + $0x290] sm:$0xff]  ;;  %p2741_p9 = pneg %p2740_p8 }
  0xd4   : > { %726 = vmatmul.f32.gmra.mxu0 %v665_v50  ;;  %v988_v50 = vld [vmem:[#allocation11 + $0x60] sm:$0xff]  ;;  %p2746_p13 = pnand %p2745_p10, %p2741_p9 }
  0xd5   : > { %1131 = vmatpush.msra.mxu3 %v988_v50  ;;  %v880_v50 = vmax.f32 %v878_v47, 0.0  ;;  %v1052_v47 = vld [vmem:[#allocation11 + $0x260] sm:$0xff] }
  0xd7   : > { %1132 = vmatpush.msra.mxu3 %v985_v55  ;;  %914 = vmatmul.f32.vlgmr.msra.gmra.mxu2 %v880_v50  ;;  %v1084_v50 = vld [vmem:[#allocation11 + $0x360] sm:$0xff] }
  0xd8   : > { %1250 = vmatpush.msra.mxu2 %v1117_v3  ;;  %v3448_v3 = vld [vmem:[#allocation11 + $0x1f0] sm:$0xff] }
  0xdc   : > { %729 = vmatmul.f32.gmra.mxu0 %v666_v54  ;;  %v638_v54 = vmul.f32 %v3259_v10, %v619_v49  ;;  %v1097_v49 = vld [vmem:[#allocation11 + $0x3c8] sm:$0xff] }
  0xde   : > { %v657_v61 = vadd.f32 %v3268_v16, %v638_v54  ;;  %v877_v54 = vmul.f32 %v3259_v10, %v875_v52  ;;  %v3429_v52 = vld [vmem:[#allocation11 + $0x250] sm:$0xff] }
  0xe0   : > { %v673_v4 = vmax.f32 %v657_v61, 0.0 }
  0xe4   : > { %732 = vmatmul.f32.gmra.mxu0 %v667_v58  ;;  %v982_v58 = vld [vmem:[#allocation11 + $0x30] sm:$0xff] }
  0xe5   : > { %1133 = vmatpush.msra.mxu3 %v982_v58  ;;  %v879_v58 = vadd.f32 %v3268_v16, %v877_v54  ;;  %v1046_v54 = vld [vmem:[#allocation11 + $0x230] sm:$0xff] }
  0xe7   : > { %v881_v61 = vmax.f32 %v879_v58, 0.0  ;;  %v1081_v58 = vld [vmem:[#allocation11 + $0x348] sm:$0xff] }
  0xe9   : > { %917 = vmatmul.f32.gmra.mxu2 %v881_v61  ;;  %v3438_v61 = vld [vmem:[#allocation11 + $0x220] sm:$0xff] }
  0xec   : > { %735 = vmatmul.f32.gmra.mxu0 %v668_v62  ;;  %v979_v62 = vld [vmem:[#allocation11 + $0x18] sm:$0xff] }
  0xed   : > { %1134 = vmatpush.msra.mxu3 %v979_v62  ;;  %v1082_v62 = vld [vmem:[#allocation11 + $0x350] sm:$0xff] }
  0xef   : > { %1135 = vmatpush.msra.mxu3 %v976_v2  ;;  %v1073_v2 = vld [vmem:[#allocation11 + $0x308] sm:$0xff] }
  0xf4   : > { %738 = vmatmul.f32.gmra.mxu0 %v669_v9  ;;  %v640_v9 = vmul.f32 %v3259_v10, %v621_v7  ;;  %v1079_v10 = vld [vmem:[#allocation11 + $0x338] sm:$0xff]  ;;  %v1114_v7 = vld [vmem:[#allocation11 + $0x450] sm:$0xff] }
  0xf5   : > { %1251 = vmatpush.msra.mxu2 %v1114_v7  ;;  %v1072_v7 = vld [vmem:[#allocation11 + $0x300] sm:$0xff] }
  0xf6   : > { %v659_v11 = vadd.f32 %v3268_v16, %v640_v9  ;;  %v1108_v9 = vld [vmem:[#allocation11 + $0x420] sm:$0xff] }
  0xf8   : > { %v675_v12 = vmax.f32 %v659_v11, 0.0 }
  0xfc   : > { %741 = vmatmul.f32.gmra.mxu0 %v670_v24 }
 0x104   : > { %744 = vmatmul.f32.gmra.mxu0 %v671_v39  ;;  %v1109_v39 = vld [vmem:[#allocation11 + $0x428] sm:$0xff] }
 0x105   : > { %1448 = vmatpush.msra.mxu1 %v1109_v39  ;;  %v3413_v39 = vld [vmem:[#allocation11 + $0x298] sm:$0xff] }
 0x107   : > { %1449 = vmatpush.msra.mxu1 %v1106_v40 }
 0x109   : > { %1450 = vmatpush.msra.mxu1 %v1103_v42  ;;  %v1055_v42 = vld [vmem:[#allocation11 + $0x278] sm:$0xff] }
 0x10b   : > { %1451 = vmatpush.msra.mxu1 %v1100_v46  ;;  %v1087_v46 = vld [vmem:[#allocation11 + $0x378] sm:$0xff] }
 0x10c   : > { %747 = vmatmul.f32.gmra.mxu0 %v672_v53  ;;  %v1091_v53 = vld [vmem:[#allocation11 + $0x398] sm:$0xff] }
 0x10d   : > { %1452 = vmatpush.msra.mxu1 %v1097_v49  ;;  %v3425_v49 = vld [vmem:[#allocation11 + $0x268] sm:$0xff] }
 0x10f   : > { %1453 = vmatpush.msra.mxu1 %v1094_v51  ;;  %v1049_v51 = vld [vmem:[#allocation11 + $0x248] sm:$0xff] }
 0x111   : > { %1454 = vmatpush.msra.mxu1 %v1091_v53 }
 0x113   : > { %1455 = vmatpush.msra.mxu1 %v1088_v57 }
 0x114   : > { %750 = vmatmul.f32.gmra.mxu0 %v673_v4 }
 0x115   : > { %1456 = vmatpush.msra.mxu1 %v1085_v60  ;;  %v1043_v60 = vld [vmem:[#allocation11 + $0x218] sm:$0xff] }
 0x117   : > { %1457 = vmatpush.msra.mxu1 %v1082_v62  ;;  %v1078_v62 = vld [vmem:[#allocation11 + $0x330] sm:$0xff] }
 0x119   : > { %1458 = vmatpush.msra.mxu1 %v1079_v10  ;;  %v1040_v10 = vld [vmem:[#allocation11 + $0x200] sm:$0xff] }
 0x11b   : > { %1459 = vmatpush.msra.mxu1 %v1076_v0  ;;  %v1075_v0 = vld [vmem:[#allocation11 + $0x318] sm:$0xff] }
 0x11c   : > { %753 = vmatmul.f32.gmra.mxu0 %v674_v8  ;;  %v1111_v8 = vld [vmem:[#allocation11 + $0x438] sm:$0xff] }
 0x11d   : > { %1460 = vmatpush.msra.mxu1 %v1073_v2  ;;  %1252 = vmatpush.msra.mxu2 %v1111_v8 }
 0x11f   : > { %1253 = vmatpush.msra.mxu2 %v1108_v9  ;;  %v3455_v9 = vld [vmem:[#allocation11 + $0x1d8] sm:$0xff] }
 0x124   : > { %756 = vmatmul.f32.gmra.mxu0 %v675_v12 }
 0x129   : > { %v712_v14 = vpop.f32.mrf.mxu0  ;;  %v847_v15 = vpop.f32.mrf.mxu1 }
 0x12a   : > { %v713_v17 = vadd.f32 %v3326_v13, %v712_v14  ;;  %v848_v18 = vadd.f32 %v3326_v13, %v847_v15  ;;  %v1105_v15 = vld [vmem:[#allocation11 + $0x408] sm:$0xff] }
 0x12b   : > { %1254 = vmatpush.msra.mxu2 %v1105_v15  ;;  %v1028_v15 = vld [vmem:[#allocation11 + $0x1a0] sm:$0xff] }
 0x12c   : > { %v3330_v20 = vmax.f32 %v713_v17, 0.0  ;;  %v853_v21 = vmax.f32 %v848_v18, 0.0  ;;  %v1102_v17 = vld [vmem:[#allocation11 + $0x3f0] sm:$0xff]  ;;  %v1099_v18 = vld [vmem:[#allocation11 + $0x3d8] sm:$0xff] }
 0x12d   : > { %1255 = vmatpush.msra.mxu2 %v1102_v17  ;;  %v1023_v17 = vld [vmem:[#allocation11 + $0x178] sm:$0xff] }
 0x12e   : > { %1201 = vmatmul.f32.vlgmr.msrb.gmra.mxu1 %v3330_v20  ;;  %v3333_v22 = vmul.f32 %v855_v19, %v853_v21  ;;  %v3396_v21 = vld [vmem:[#allocation11 + $0x2f8] sm:$0xff] }
 0x12f   : > { %1256 = vmatpush.msra.mxu2 %v1099_v18  ;;  %1575 = vmatpush.msra.mxu0 %v3396_v21  ;;  %v3464_v18 = vld [vmem:[#allocation11 + $0x1a8] sm:$0xff] }
 0x130   : > { %1136 = vmatmul.f32.vlgmr.msra.gmra.mxu3 %v3333_v22  ;;  %1331 = vmatmul.f32.vlgmr.msrb.gmra.mxu0 %v3333_v22 }
 0x131   : > { %v715_v23 = vpop.f32.mrf.mxu0  ;;  %v850_v24 = vpop.f32.mrf.mxu1 }
 0x132   : > { %v716_v25 = vadd.f32 %v3326_v13, %v715_v23  ;;  %v851_v26 = vadd.f32 %v3326_v13, %v850_v24 }
 0x134   : > { %v3339_v27 = vmax.f32 %v716_v25, 0.0  ;;  %v854_v28 = vmax.f32 %v851_v26, 0.0  ;;  %v1067_v25 = vld [vmem:[#allocation11 + $0x2d8] sm:$0xff]  ;;  %v3400_v26 = vld [vmem:[#allocation11 + $0x2e0] sm:$0xff] }
 0x135   : > { %1576 = vmatpush.msra.mxu0 %v3400_v26 }
 0x136   : > { %1204 = vmatmul.f32.gmra.mxu1 %v3339_v27  ;;  %v3342_v29 = vmul.f32 %v855_v19, %v854_v28  ;;  %v1070_v19 = vld [vmem:[#allocation11 + $0x2f0] sm:$0xff] }
 0x137   : > { %1380 = vmatpush.msrb.mxu3 %v1070_v19  ;;  %1577 = vmatpush.msra.mxu0 %v3405_v33  ;;  %v1025_v19 = vld [vmem:[#allocation11 + $0x188] sm:$0xff] }
 0x138   : > { %1139 = vmatmul.f32.gmra.mxu3 %v3342_v29  ;;  %1334 = vmatmul.f32.gmra.mxu0 %v3342_v29 }
 0x139   : > { %v718_v30 = vpop.f32.mrf.mxu0  ;;  %1381 = vmatpush.msrb.mxu3 %v1067_v25  ;;  %v3468_v25 = vld [vmem:[#allocation11 + $0x190] sm:$0xff] }
 0x13a   : > { %v719_v31 = vadd.f32 %v3326_v13, %v718_v30  ;;  %v1096_v30 = vld [vmem:[#allocation11 + $0x3c0] sm:$0xff] }
 0x13b   : > { %1257 = vmatpush.msra.mxu2 %v1096_v30 }
 0x13c   : > { %v3347_v32 = vmax.f32 %v719_v31, 0.0  ;;  %v1064_v31 = vld [vmem:[#allocation11 + $0x2c0] sm:$0xff] }
 0x13d   : > { %1382 = vmatpush.msrb.mxu3 %v1064_v31  ;;  %1258 = vmatpush.msra.mxu2 %v1093_v34  ;;  %v1020_v31 = vld [vmem:[#allocation11 + $0x160] sm:$0xff] }
 0x13e   : > { %1207 = vmatmul.f32.gmra.mxu1 %v3347_v32 }
 0x140   : > { %1142 = vmatmul.f32.gmra.mxu3 %v3330_v20  ;;  %1337 = vmatmul.f32.gmra.mxu0 %v3330_v20 }
 0x141   : > { %v721_v35 = vpop.f32.mrf.mxu0 }
 0x142   : > { %v722_v36 = vadd.f32 %v3326_v13, %v721_v35  ;;  %v1061_v35 = vld [vmem:[#allocation11 + $0x2a8] sm:$0xff] }
 0x143   : > { %1383 = vmatpush.msrb.mxu3 %v1061_v35 }
 0x144   : > { %v3353_v38 = vmax.f32 %v722_v36, 0.0  ;;  %v3409_v36 = vld [vmem:[#allocation11 + $0x2b0] sm:$0xff] }
 0x145   : > { %1578 = vmatpush.msra.mxu0 %v3409_v36  ;;  %1384 = vmatpush.msrb.mxu3 %v1058_v37 }
 0x146   : > { %1210 = vmatmul.f32.gmra.mxu1 %v3353_v38 }
 0x147   : > { %1579 = vmatpush.msra.mxu0 %v3413_v39  ;;  %1385 = vmatpush.msrb.mxu3 %v1055_v42 }
 0x148   : > { %1145 = vmatmul.f32.gmra.mxu3 %v3339_v27  ;;  %1340 = vmatmul.f32.gmra.mxu0 %v3339_v27 }
 0x149   : > { %v724_v44 = vpop.f32.mrf.mxu0  ;;  %1580 = vmatpush.msra.mxu0 %v3417_v43  ;;  %1386 = vmatpush.msrb.mxu3 %v1052_v47  ;;  %v1011_v47 = vld [vmem:[#allocation11 + $0x118] sm:$0xff] }
 0x14a   : > { %v725_v45 = vadd.f32 %v3326_v13, %v724_v44 }
 0x14b   : > { %1581 = vmatpush.msra.mxu0 %v3425_v49  ;;  %1387 = vmatpush.msrb.mxu3 %v1049_v51 }
 0x14c   : > { %v3363_v48 = vmax.f32 %v725_v45, 0.0  ;;  %v1090_v45 = vld [vmem:[#allocation11 + $0x390] sm:$0xff] }
 0x14d   : > { %1259 = vmatpush.msra.mxu2 %v1090_v45  ;;  %1582 = vmatpush.msra.mxu0 %v3429_v52 }
 0x14e   : > { %1213 = vmatmul.f32.gmra.mxu1 %v3363_v48  ;;  %1388 = vmatpush.msrb.mxu3 %v1046_v54  ;;  %v1008_v54 = vld [vmem:[#allocation11 + $0x100] sm:$0xff] }
 0x14f   : > { %1260 = vmatpush.msra.mxu2 %v1087_v46  ;;  %v1014_v46 = vld [vmem:[#allocation11 + $0x130] sm:$0xff] }
 0x150   : > { %1148 = vmatmul.f32.gmra.mxu3 %v3347_v32  ;;  %1343 = vmatmul.f32.gmra.mxu0 %v3347_v32 }
 0x151   : > { %v727_v55 = vpop.f32.mrf.mxu0  ;;  %1261 = vmatpush.msra.mxu2 %v1084_v50  ;;  %1389 = vmatpush.msrb.mxu3 %v1043_v60 }
 0x152   : > { %v728_v56 = vadd.f32 %v3326_v13, %v727_v55 }
 0x153   : > { %1262 = vmatpush.msra.mxu2 %v1081_v58  ;;  %1390 = vmatpush.msrb.mxu3 %v1040_v10 }
 0x154   : > { %v3373_v59 = vmax.f32 %v728_v56, 0.0  ;;  %v3433_v56 = vld [vmem:[#allocation11 + $0x238] sm:$0xff] }
 0x155   : > { %1583 = vmatpush.msra.mxu0 %v3433_v56  ;;  %1263 = vmatpush.msra.mxu2 %v1078_v62  ;;  %v1005_v62 = vld [vmem:[#allocation11 + $0xe8] sm:$0xff] }
 0x156   : > { %1216 = vmatmul.f32.gmra.mxu1 %v3373_v59 }
 0x157   : > { %1584 = vmatpush.msra.mxu0 %v3438_v61  ;;  %1264 = vmatpush.msra.mxu2 %v1075_v0 }
 0x158   : > { %1151 = vmatmul.f32.gmra.mxu3 %v3353_v38  ;;  %1346 = vmatmul.f32.gmra.mxu0 %v3353_v38 }
 0x159   : > { %v730_v63 = vpop.f32.mrf.mxu0  ;;  %1265 = vmatpush.msra.mxu2 %v1072_v7 }
 0x15a   : > { %v731_v16 = vadd.f32 %v3326_v13, %v730_v63  ;;  %v3444_v63 = vld [vmem:[#allocation11 + $0x208] sm:$0xff] }
 0x15b   : > { %1585 = vmatpush.msra.mxu0 %v3444_v63 }
 0x15c   : > { %v3379_v1 = vmax.f32 %v731_v16, 0.0  ;;  %v1037_v16 = vld [vmem:[#allocation11 + $0x1e8] sm:$0xff] }
 0x15d   : > { %1391 = vmatpush.msrb.mxu3 %v1037_v16  ;;  %1586 = vmatpush.msra.mxu0 %v3448_v3  ;;  %v1002_v16 = vld [vmem:[#allocation11 + $0xd0] sm:$0xff] }
 0x15e   : > { %1219 = vmatmul.f32.gmra.mxu1 %v3379_v1 }
 0x15f   : > { %1587 = vmatpush.msra.mxu0 %v3455_v9 }
 0x160   : > { %1154 = vmatmul.f32.gmra.mxu3 %v3363_v48  ;;  %1349 = vmatmul.f32.gmra.mxu0 %v3363_v48 }
 0x161   : > { %v733_v4 = vpop.f32.mrf.mxu0 }
 0x162   : > { %v734_v5 = vadd.f32 %v3326_v13, %v733_v4 }
 0x164   : > { %v3385_v6 = vmax.f32 %v734_v5, 0.0  ;;  %v1034_v5 = vld [vmem:[#allocation11 + $0x1d0] sm:$0xff] }
 0x165   : > { %1392 = vmatpush.msrb.mxu3 %v1034_v5 }
 0x166   : > { %1222 = vmatmul.f32.gmra.mxu1 %v3385_v6 }
 0x168   : > { %1157 = vmatmul.f32.gmra.mxu3 %v3373_v59  ;;  %1352 = vmatmul.f32.gmra.mxu0 %v3373_v59 }
 0x169   : > { %v736_v11 = vpop.f32.mrf.mxu0 }
 0x16a   : > { %v737_v12 = vadd.f32 %v3326_v13, %v736_v11  ;;  %v1031_v11 = vld [vmem:[#allocation11 + $0x1b8] sm:$0xff] }
 0x16b   : > { %1393 = vmatpush.msrb.mxu3 %v1031_v11  ;;  %v996_v11 = vld [vmem:[#allocation11 + $0xa0] sm:$0xff] }
 0x16c   : > { %v3391_v14 = vmax.f32 %v737_v12, 0.0  ;;  %v3459_v12 = vld [vmem:[#allocation11 + $0x1c0] sm:$0xff] }
 0x16d   : > { %1588 = vmatpush.msra.mxu0 %v3459_v12  ;;  %1394 = vmatpush.msrb.mxu3 %v1028_v15 }
 0x16e   : > { %4189 = vst [vmem:[#allocation38_spill] sm:$0xff] %v3391_v14  ;;  %1225 = vmatmul.f32.gmra.mxu1 %v3391_v14 }
 0x16f   : > { %1589 = vmatpush.msra.mxu0 %v3464_v18  ;;  %1395 = vmatpush.msrb.mxu3 %v1025_v19  ;;  %v915_v19 = vpop.f32.mrf.mxu2 }
 0x170   : > { %1160 = vmatmul.f32.gmra.mxu3 %v3379_v1  ;;  %1355 = vmatmul.f32.gmra.mxu0 %v3379_v1 }
 0x171   : > { %v739_v23 = vpop.f32.mrf.mxu0  ;;  %1590 = vmatpush.msra.mxu0 %v3468_v25 }
 0x172   : > { %v740_v24 = vadd.f32 %v3326_v13, %v739_v23 }
 0x174   : > { %v3402_v28 = vmax.f32 %v740_v24, 0.0 }
 0x176   : > { %4190 = vst [vmem:[#allocation39_spill] sm:$0xff] %v3402_v28  ;;  %1228 = vmatmul.f32.gmra.mxu1 %v3402_v28 }
 0x178   : > { %1163 = vmatmul.f32.gmra.mxu3 %v3385_v6  ;;  %1358 = vmatmul.f32.gmra.mxu0 %v3385_v6 }
 0x179   : > { %v742_v40 = vpop.f32.mrf.mxu0 }
 0x17a   : > { %v743_v41 = vadd.f32 %v3326_v13, %v742_v40  ;;  %v1017_v40 = vld [vmem:[#allocation11 + $0x148] sm:$0xff] }
 0x17c   : > { %v3420_v44 = vmax.f32 %v743_v41, 0.0 }
 0x17e   : > { %4191 = vst [vmem:[#allocation40_spill] sm:$0xff] %v3420_v44  ;;  %1231 = vmatmul.f32.vlgmr.msrb.gmra.mxu2 %v3420_v44  ;;  %1461 = vmatmul.f32.vlgmr.msra.gmra.mxu1 %v3347_v32 }
 0x17f   : > { %1510 = vmatpush.msrb.mxu2 %v1023_v17 }
 0x180   : > { %1166 = vmatmul.f32.gmra.mxu3 %v3391_v14  ;;  %1361 = vmatmul.f32.gmra.mxu0 %v3391_v14 }
 0x181   : > { %v745_v53 = vpop.f32.mrf.mxu0  ;;  %1511 = vmatpush.msrb.mxu2 %v1020_v31 }
 0x182   : > { %v746_v55 = vadd.f32 %v3326_v13, %v745_v53 }
 0x183   : > { %1512 = vmatpush.msrb.mxu2 %v1017_v40  ;;  %v990_v40 = vld [vmem:[#allocation11 + $0x70] sm:$0xff] }
 0x184   : > { %v3436_v57 = vmax.f32 %v746_v55, 0.0 }
 0x185   : > { %1513 = vmatpush.msrb.mxu2 %v1014_v46  ;;  %v918_v46 = vpop.f32.mrf.mxu2 }
 0x186   : > { %4192 = vst [vmem:[#allocation41_spill] sm:$0xff] %v3436_v57  ;;  %1234 = vmatmul.f32.gmra.mxu2 %v3436_v57  ;;  %1464 = vmatmul.f32.gmra.mxu1 %v3353_v38 }
 0x187   : > { %1514 = vmatpush.msrb.mxu2 %v1011_v47 }
 0x188   : > { %1169 = vmatmul.f32.gmra.mxu3 %v3402_v28  ;;  %1364 = vmatmul.f32.gmra.mxu0 %v3402_v28 }
 0x189   : > { %v748_v2 = vpop.f32.mrf.mxu0  ;;  %1515 = vmatpush.msrb.mxu2 %v1008_v54 }
 0x18a   : > { %v749_v4 = vadd.f32 %v3326_v13, %v748_v2 }
 0x18b   : > { %1516 = vmatpush.msrb.mxu2 %v1005_v62  ;;  %v3561_v62 = vld [vmem:[#allocation11 + $0x478] sm:$0xff] }
 0x18c   : > { %v3452_v8 = vmax.f32 %v749_v4, 0.0  ;;  %v999_v4 = vld [vmem:[#allocation11 + $0xb8] sm:$0xff]  ;;  %2332 = vmatpush.msra.mxu3 %v3561_v62 }
 0x18d   : > { %1517 = vmatpush.msrb.mxu2 %v1002_v16 }
 0x18e   : > { %1237 = vmatmul.f32.gmra.mxu2 %v3452_v8  ;;  %1467 = vmatmul.f32.gmra.mxu1 %v3363_v48 }
 0x18f   : > { %1518 = vmatpush.msrb.mxu2 %v999_v4  ;;  %v3568_v4 = vld [vmem:[#allocation11 + $0x460] sm:$0xff] }
 0x190   : > { %1172 = vmatmul.f32.gmra.mxu3 %v3420_v44  ;;  %1367 = vmatmul.f32.gmra.mxu0 %v3420_v44 }
 0x191   : > { %v751_v23 = vpop.f32.mrf.mxu0  ;;  %1519 = vmatpush.msrb.mxu2 %v996_v11  ;;  %2333 = vmatpush.msra.mxu3 %v3568_v4 }
 0x192   : > { %v752_v24 = vadd.f32 %v3326_v13, %v751_v23  ;;  %v993_v23 = vld [vmem:[#allocation11 + $0x88] sm:$0xff] }
 0x193   : > { %1520 = vmatpush.msrb.mxu2 %v993_v23  ;;  %v984_v23 = vld [vmem:[#allocation11 + $0x40] sm:$0xff] }
 0x194   : > { %v3471_v30 = vmax.f32 %v752_v24, 0.0  ;;  %v916_v24 = vadd.f32 %v3326_v13, %v915_v19  ;;  %v3573_v19 = vld [vmem:[#allocation11 + $0x448] sm:$0xff] }
 0x195   : > { %1521 = vmatpush.msrb.mxu2 %v990_v40  ;;  %2334 = vmatpush.msra.mxu3 %v3573_v19 }
 0x196   : > { %1240 = vmatmul.f32.gmra.mxu2 %v3471_v30  ;;  %1470 = vmatmul.f32.gmra.mxu1 %v3373_v59 }
 0x198   : > { %1175 = vmatmul.f32.gmra.mxu3 %v3436_v57  ;;  %1370 = vmatmul.f32.gmra.mxu0 %v3436_v57 }
 0x199   : > { %v754_v34 = vpop.f32.mrf.mxu0 }
 0x19a   : > { %v755_v35 = vadd.f32 %v3326_v13, %v754_v34 }
 0x19c   : > { %v3479_v37 = vmax.f32 %v755_v35, 0.0  ;;  %v921_v35 = vmax.f32 %v916_v24, 0.0  ;;  %v3578_v24 = vld [vmem:[#allocation11 + $0x430] sm:$0xff] }
 0x19d   : > { %2335 = vmatpush.msra.mxu3 %v3578_v24 }
 0x19e   : > { %1243 = vmatmul.f32.gmra.mxu2 %v3479_v37  ;;  %1473 = vmatmul.f32.gmra.mxu1 %v3379_v1 }
 0x1a0   : > { %1178 = vmatmul.f32.gmra.mxu3 %v3452_v8  ;;  %1373 = vmatmul.f32.gmra.mxu0 %v3452_v8 }
 0x1a1   : > { %v757_v41 = vpop.f32.mrf.mxu0 }
 0x1a2   : > { %v758_v42 = vadd.f32 %v3326_v13, %v757_v41 }
 0x1a4   : > { %v3486_v45 = vmax.f32 %v758_v42, 0.0  ;;  %v923_v42 = vstv %s605_s26 }
 0x1a5   : > { %v3550_v47 = vmul.f32 %v923_v42, %v921_v35  ;;  %v3583_v35 = vld [vmem:[#allocation11 + $0x418] sm:$0xff] }
 0x1a6   : > { %1246 = vmatmul.f32.gmra.mxu2 %v3486_v45  ;;  %1476 = vmatmul.f32.gmra.mxu1 %v3385_v6 }
 0x1a7   : > { %2336 = vmatpush.msra.mxu3 %v3583_v35 }
 0x1a8   : > { %1181 = vmatmul.f32.gmra.mxu3 %v3471_v30  ;;  %1376 = vmatmul.f32.gmra.mxu0 %v3471_v30 }
 0x1ab   : > { %v1202_v50 = vpop.f32.mrf.mxu1 }
 0x1ad   : > { %v3542_v34 = vpop.f32.mrf.mxu0 }
 0x1ae   : > { %1266 = vmatmul.f32.vlgmr.msra.gmra.mxu2 %v3347_v32  ;;  %1479 = vmatmul.f32.gmra.mxu1 %v3391_v14  ;;  %4194 = vst [vmem:[#allocation43_spill] sm:$0xff] %v3542_v34  ;;  %v3604_v34 = vld [vmem:[#allocation11 + $0x3b8] sm:$0xff] }
 0x1b0   : > { %1396 = vmatmul.f32.vlgmr.msrb.gmra.mxu3 %v3330_v20  ;;  %1591 = vmatmul.f32.vlgmr.msra.gmra.mxu0 %v3330_v20 }
 0x1b3   : > { %v1137_v51 = vpop.f32.mrf.mxu3  ;;  %v1205_v55 = vpop.f32.mrf.mxu1 }
 0x1b4   : > { %v3496_v53 = vadd.f32 %v1202_v50, %v1137_v51  ;;  %v919_v50 = vadd.f32 %v3326_v13, %v918_v46 }
 0x1b6   : > { %1269 = vmatmul.f32.gmra.mxu2 %v3353_v38  ;;  %1482 = vmatmul.f32.gmra.mxu1 %v3402_v28  ;;  %v922_v54 = vmax.f32 %v919_v50, 0.0 }
 0x1b8   : > { %1399 = vmatmul.f32.gmra.mxu3 %v3339_v27  ;;  %1594 = vmatmul.f32.gmra.mxu0 %v3339_v27  ;;  %v3566_v13 = vmul.f32 %v923_v42, %v922_v54  ;;  %v3588_v42 = vld [vmem:[#allocation11 + $0x400] sm:$0xff]  ;;  %v3595_v54 = vld [vmem:[#allocation11 + $0x3e8] sm:$0xff] }
 0x1b9   : > { %2337 = vmatpush.msra.mxu3 %v3588_v42 }
 0x1bb   : > { %v1140_v58 = vpop.f32.mrf.mxu3  ;;  %v3514_v0 = vpop.f32.mrf.mxu1  ;;  %2338 = vmatpush.msra.mxu3 %v3595_v54 }
 0x1bc   : > { %v3502_v60 = vadd.f32 %v1205_v55, %v1140_v58  ;;  %v987_v55 = vld [vmem:[#allocation11 + $0x58] sm:$0xff]  ;;  %v3557_v58 = vpop.f32.mrf.mxu0 }
 0x1bd   : > { %1522 = vmatpush.msrb.mxu2 %v987_v55  ;;  %v981_v55 = vld [vmem:[#allocation11 + $0x28] sm:$0xff] }
 0x1be   : > { %1272 = vmatmul.f32.gmra.mxu2 %v3363_v48  ;;  %1485 = vmatmul.f32.gmra.mxu1 %v3420_v44 }
 0x1bf   : > { %1523 = vmatpush.msrb.mxu2 %v984_v23  ;;  %v3599_v23 = vld [vmem:[#allocation11 + $0x3d0] sm:$0xff] }
 0x1c0   : > { %1402 = vmatmul.f32.gmra.mxu3 %v3347_v32  ;;  %1597 = vmatmul.f32.gmra.mxu0 %v3347_v32 }
 0x1c1   : > { %1524 = vmatpush.msrb.mxu2 %v981_v55  ;;  %2339 = vmatpush.msra.mxu3 %v3599_v23  ;;  %v3614_v55 = vld [vmem:[#allocation11 + $0x388] sm:$0xff] }
 0x1c3   : > { %v3508_v10 = vpop.f32.mrf.mxu3  ;;  %v3522_v5 = vpop.f32.mrf.mxu1  ;;  %2340 = vmatpush.msra.mxu3 %v3604_v34 }
 0x1c4   : > { %v3586_v40 = vpop.f32.mrf.mxu0 }
 0x1c6   : > { %1275 = vmatmul.f32.gmra.mxu2 %v3373_v59  ;;  %1488 = vmatmul.f32.gmra.mxu1 %v3436_v57 }
 0x1c8   : > { %1405 = vmatmul.f32.gmra.mxu3 %v3353_v38  ;;  %1600 = vmatmul.f32.gmra.mxu0 %v3353_v38 }
 0x1cb   : > { %v3516_v2 = vpop.f32.mrf.mxu3  ;;  %v3532_v17 = vpop.f32.mrf.mxu1 }
 0x1ce   : > { %1278 = vmatmul.f32.gmra.mxu2 %v3379_v1  ;;  %1491 = vmatmul.f32.gmra.mxu1 %v3452_v8 }
 0x1d0   : > { %1408 = vmatmul.f32.gmra.mxu3 %v3363_v48  ;;  %1603 = vmatmul.f32.gmra.mxu0 %v3363_v48 }
 0x1d3   : > { %v3524_v7 = vpop.f32.mrf.mxu3  ;;  %v3546_v41 = vpop.f32.mrf.mxu1 }
 0x1d4   : > { %4195 = vst [vmem:[#allocation44_spill] sm:$0xff] %v3546_v41 }
 0x1d6   : > { %1281 = vmatmul.f32.gmra.mxu2 %v3385_v6  ;;  %1494 = vmatmul.f32.gmra.mxu1 %v3471_v30 }
 0x1d8   : > { %1411 = vmatmul.f32.gmra.mxu3 %v3373_v59  ;;  %1606 = vmatmul.f32.gmra.mxu0 %v3373_v59 }
 0x1db   : > { %v3530_v15 = vpop.f32.mrf.mxu3  ;;  %v3563_v16 = vpop.f32.mrf.mxu1 }
 0x1dc   : > { %4197 = vst [vmem:[#allocation46_spill] sm:$0xff] %v3563_v16 }
 0x1de   : > { %1284 = vmatmul.f32.gmra.mxu2 %v3391_v14  ;;  %1497 = vmatmul.f32.gmra.mxu1 %v3479_v37 }
 0x1e0   : > { %1414 = vmatmul.f32.gmra.mxu3 %v3379_v1  ;;  %1609 = vmatmul.f32.gmra.mxu0 %v3379_v1 }
 0x1e3   : > { %v3540_v31 = vpop.f32.mrf.mxu3  ;;  %v3590_v46 = vpop.f32.mrf.mxu1 }
 0x1e4   : > { %4193 = vst [vmem:[#allocation42_spill] sm:$0xff] %v3540_v31  ;;  %v3620_v31 = vld [vmem:[#allocation11 + $0x370] sm:$0xff] }
 0x1e5   : > { %4199 = vst [vmem:[#allocation48_spill] sm:$0xff] %v3590_v46 }
 0x1e6   : > { %1287 = vmatmul.f32.gmra.mxu2 %v3402_v28  ;;  %1500 = vmatmul.f32.gmra.mxu1 %v3486_v45 }
 0x1e8   : > { %1417 = vmatmul.f32.gmra.mxu3 %v3385_v6  ;;  %1612 = vmatmul.f32.gmra.mxu0 %v3385_v6 }
 0x1eb   : > { %v3553_v51 = vpop.f32.mrf.mxu3  ;;  %v3616_v16 = vpop.f32.mrf.mxu1 }
 0x1ec   : > { %4196 = vst [vmem:[#allocation45_spill] sm:$0xff] %v3553_v51  ;;  %v3610_v51 = vpop.f32.mrf.mxu0 }
 0x1ed   : > { %4202 = vst [vmem:[#allocation51_spill] sm:$0xff] %v3616_v16 }
 0x1ee   : > { %1290 = vmatmul.f32.gmra.mxu2 %v3420_v44  ;;  %1503 = vmatmul.f32.gmra.mxu1 %v3550_v47 }
 0x1f0   : > { %1420 = vmatmul.f32.gmra.mxu3 %v3391_v14  ;;  %1615 = vmatmul.f32.gmra.mxu0 %v3391_v14  ;;  %v3635_v14 = vld [vmem:[#allocation11 + $0x328] sm:$0xff] }
 0x1f3   : > { %v3570_v11 = vpop.f32.mrf.mxu3  ;;  %v3644_v41 = vpop.f32.mrf.mxu1 }
 0x1f4   : > { %4198 = vst [vmem:[#allocation47_spill] sm:$0xff] %v3570_v11  ;;  %v3607_v11 = vld [vmem:[#allocation11 + $0x3a0] sm:$0xff] }
 0x1f5   : > { %2341 = vmatpush.msra.mxu3 %v3607_v11 }
 0x1f6   : > { %1293 = vmatmul.f32.gmra.mxu2 %v3436_v57  ;;  %1506 = vmatmul.f32.gmra.mxu1 %v3566_v13 }
 0x1f7   : > { %2342 = vmatpush.msra.mxu3 %v3614_v55 }
 0x1f8   : > { %1423 = vmatmul.f32.gmra.mxu3 %v3402_v28  ;;  %1618 = vmatmul.f32.gmra.mxu0 %v3402_v28 }
 0x1f9   : > { %2343 = vmatpush.msra.mxu3 %v3620_v31 }
 0x1fb   : > { %v3592_v50 = vpop.f32.mrf.mxu3 }
 0x1fc   : > { %4200 = vst [vmem:[#allocation49_spill] sm:$0xff] %v3592_v50 }
 0x1fe   : > { %1296 = vmatmul.f32.gmra.mxu2 %v3452_v8 }
 0x200   : > { %1426 = vmatmul.f32.gmra.mxu3 %v3420_v44  ;;  %1621 = vmatmul.f32.gmra.mxu0 %v3420_v44  ;;  %v978_v44 = vld [vmem:[#allocation11 + $0x10] sm:$0xff] }
 0x201   : > { %v1232_v50 = vpop.f32.mrf.mxu2  ;;  %1525 = vmatpush.msrb.mxu2 %v978_v44 }
 0x203   : > { %v1167_v46 = vpop.f32.mrf.mxu3  ;;  %2316 = vmatpush.msra.mxu2 %v3396_v21  ;;  %v3642_v21 = vld [vmem:[#allocation11 + $0x310] sm:$0xff] }
 0x204   : > { %v3612_v28 = vadd.f32 %v1232_v50, %v1167_v46  ;;  %v3625_v46 = vld [vmem:[#allocation11 + $0x358] sm:$0xff] }
 0x205   : > { %2344 = vmatpush.msra.mxu3 %v3625_v46  ;;  %2317 = vmatpush.msra.mxu2 %v3400_v26 }
 0x206   : > { %4201 = vst [vmem:[#allocation50_spill] sm:$0xff] %v3612_v28  ;;  %1299 = vmatmul.f32.gmra.mxu2 %v3471_v30  ;;  %v3629_v28 = vld [vmem:[#allocation11 + $0x340] sm:$0xff] }
 0x207   : > { %2345 = vmatpush.msra.mxu3 %v3629_v28  ;;  %2318 = vmatpush.msra.mxu2 %v3405_v33 }
 0x208   : > { %1429 = vmatmul.f32.gmra.mxu3 %v3436_v57  ;;  %1624 = vmatmul.f32.gmra.mxu0 %v3436_v57  ;;  %v3639_v57 = vpop.f32.mrf.mxu0 }
 0x209   : > { %v1235_v50 = vpop.f32.mrf.mxu2  ;;  %2346 = vmatpush.msra.mxu3 %v3635_v14  ;;  %2319 = vmatpush.msra.mxu2 %v3409_v36  ;;  %v3661_v36 = vpop.f32.mrf.mxu1 }
 0x20b   : > { %v1170_v16 = vpop.f32.mrf.mxu3  ;;  %2347 = vmatpush.msra.mxu3 %v3642_v21  ;;  %2320 = vmatpush.msra.mxu2 %v3413_v39 }
 0x20c   : > { %v3633_v44 = vadd.f32 %v1235_v50, %v1170_v16 }
 0x20d   : > { %2321 = vmatpush.msra.mxu2 %v3417_v43 }
 0x20e   : > { %1302 = vmatmul.f32.gmra.mxu2 %v3479_v37 }
 0x20f   : > { %2322 = vmatpush.msra.mxu2 %v3425_v49 }
 0x210   : > { %1432 = vmatmul.f32.gmra.mxu3 %v3452_v8  ;;  %1627 = vmatmul.f32.gmra.mxu0 %v3452_v8  ;;  %v3657_v50 = vpop.f32.mrf.mxu0 }
 0x211   : > { %v1238_v26 = vpop.f32.mrf.mxu2  ;;  %2323 = vmatpush.msra.mxu2 %v3429_v52  ;;  %v1465_v52 = vpop.f32.mrf.mxu1 }
 0x213   : > { %v1173_v33 = vpop.f32.mrf.mxu3  ;;  %2324 = vmatpush.msra.mxu2 %v3433_v56 }
 0x214   : > { %v3652_v16 = vadd.f32 %v1238_v26, %v1173_v33 }
 0x215   : > { %2325 = vmatpush.msra.mxu2 %v3438_v61 }
 0x216   : > { %1305 = vmatmul.f32.gmra.mxu2 %v3486_v45 }
 0x217   : > { %2326 = vmatpush.msra.mxu2 %v3444_v63 }
 0x218   : > { %1435 = vmatmul.f32.gmra.mxu3 %v3471_v30  ;;  %1630 = vmatmul.f32.gmra.mxu0 %v3471_v30 }
 0x219   : > { %v1241_v39 = vpop.f32.mrf.mxu2  ;;  %2327 = vmatpush.msra.mxu2 %v3448_v3 }
 0x21b   : > { %v1176_v43 = vpop.f32.mrf.mxu3  ;;  %2328 = vmatpush.msra.mxu2 %v3455_v9 }
 0x21c   : > { %v3665_v26 = vadd.f32 %v1241_v39, %v1176_v43  ;;  %v1468_v39 = vpop.f32.mrf.mxu1 }
 0x21d   : > { %2329 = vmatpush.msra.mxu2 %v3459_v12 }
 0x21e   : > { %1308 = vmatmul.f32.gmra.mxu2 %v3550_v47 }
 0x21f   : > { %2330 = vmatpush.msra.mxu2 %v3464_v18  ;;  %v3688_v18 = vpop.f32.mrf.mxu0 }
 0x220   : > { %1438 = vmatmul.f32.gmra.mxu3 %v3479_v37 }
 0x221   : > { %v1244_v49 = vpop.f32.mrf.mxu2  ;;  %2331 = vmatpush.msra.mxu2 %v3468_v25 }
 0x223   : > { %v1179_v33 = vpop.f32.mrf.mxu3 }
 0x224   : > { %v3673_v56 = vadd.f32 %v1244_v49, %v1179_v33 }
 0x226   : > { %1311 = vmatmul.f32.gmra.mxu2 %v3566_v13 }
 0x227   : > { %v3702_v49 = vpop.f32.mrf.mxu0 }
 0x228   : > { %1441 = vmatmul.f32.gmra.mxu3 %v3486_v45 }
 0x229   : > { %v1247_v61 = vpop.f32.mrf.mxu2 }
 0x22b   : > { %v1182_v63 = vpop.f32.mrf.mxu3 }
 0x22c   : > { %v3679_v3 = vadd.f32 %v1247_v61, %v1182_v63 }
 0x22e   : > { %1526 = vmatmul.f32.vlgmr.msrb.gmra.mxu2 %v3333_v22  ;;  %v1471_v22 = vpop.f32.mrf.mxu1 }
 0x22f   : > { %1640 = vmatpush.msrb.mxu2 %v3561_v62  ;;  %v3724_v63 = vpop.f32.mrf.mxu0 }
 0x230   : > { %1659 = vmatmul.f32.vlgmr.msra.gmra.mxu3 %v3353_v38 }
 0x231   : > { %v1267_v9 = vpop.f32.mrf.mxu2  ;;  %1641 = vmatpush.msrb.mxu2 %v3568_v4 }
 0x232   : > { %v3686_v12 = vadd.f32 %v1267_v9, %v3496_v53 }
 0x233   : > { %v3690_v25 = vpop.f32.mrf.mxu3  ;;  %1642 = vmatpush.msrb.mxu2 %v3573_v19 }
 0x234   : > { %v1727_v19 = vrot.slane %v3686_v12, 7 }
 0x235   : > { %1643 = vmatpush.msrb.mxu2 %v3578_v24 }
 0x236   : > { %1529 = vmatmul.f32.gmra.mxu2 %v3342_v29  ;;  %v1705_v29 = vlaneseq  ;;  %v1474_v33 = vpop.f32.mrf.mxu1 }
 0x237   : > { %1644 = vmatpush.msrb.mxu2 %v3583_v35 }
 0x238   : > { %1662 = vmatmul.f32.gmra.mxu3 %v3363_v48 }
 0x239   : > { %v1270_v62 = vpop.f32.mrf.mxu2  ;;  %1645 = vmatpush.msrb.mxu2 %v3588_v42 }
 0x23a   : > { %v1271_v53 = vadd.f32 %v1270_v62, %v3502_v60  ;;  %v1209_v60 = vadd.f32 %v3514_v0, %v3508_v10 }
 0x23b   : > { %v1400_v4 = vpop.f32.mrf.mxu3  ;;  %1646 = vmatpush.msrb.mxu2 %v3595_v54 }
 0x23c   : > { %v1728_v43 = vrot.slane %v1271_v53, 7  ;;  %v1401_v24 = vadd.f32 %v1400_v4, %v3557_v58  ;;  %v3715_v58 = vshrl.u32 %v1705_v29, 7 }
 0x23d   : > { %1647 = vmatpush.msrb.mxu2 %v3599_v23 }
 0x23e   : > { %v1466_v35 = vadd.f32 %v1465_v52, %v1401_v24  ;;  %v1729_v42 = vsel %vm1726_vm0, %v1727_v19, %v1728_v43  ;;  %1532 = vmatmul.f32.gmra.mxu2 %v3330_v20  ;;  %vm1840_vm1 = vcmp.gt.s32.totalorder %v3715_v58, 0  ;;  %v1477_v9 = vpop.f32.mrf.mxu1 }
 0x23f   : > { %1648 = vmatpush.msrb.mxu2 %v3604_v34 }
 0x240   : > { %v3712_v54 = vadd.f32 %v1729_v42, %v1466_v35  ;;  %1665 = vmatmul.f32.gmra.mxu3 %v3373_v59 }
 0x241   : > { %v1273_v23 = vpop.f32.mrf.mxu2  ;;  %1649 = vmatpush.msrb.mxu2 %v3607_v11 }
 0x242   : > { %v1274_v52 = vadd.f32 %v1273_v23, %v1209_v60  ;;  %v4204_v23 = vld [vmem:[#allocation38_spill] sm:$0xff] }
 0x243   : > { %v1403_v61 = vpop.f32.mrf.mxu3  ;;  %1650 = vmatpush.msrb.mxu2 %v3614_v55  ;;  %v1212_v55 = vadd.f32 %v3522_v5, %v3516_v2  ;;  %v1215_v5 = vadd.f32 %v3532_v17, %v3524_v7  ;;  %v4203_v17 = vld [vmem:[#allocation44_spill] sm:$0xff] }
 0x244   : > { %v1730_v20 = vrot.slane %v1274_v52, 7  ;;  %v1404_v34 = vadd.f32 %v1403_v61, %v3586_v40  ;;  %v1218_v42 = vadd.f32 %v4203_v17, %v3530_v15  ;;  %v4206_v15 = vld [vmem:[#allocation46_spill] sm:$0xff] }
 0x245   : > { %1651 = vmatpush.msrb.mxu2 %v3620_v31 }
 0x246   : > { %v1731_v10 = vsel %vm1726_vm0, %v1728_v43, %v1730_v20  ;;  %v1469_v0 = vadd.f32 %v1468_v39, %v1404_v34  ;;  %1535 = vmatmul.f32.gmra.mxu2 %v3339_v27 }
 0x247   : > { %v1844_v11 = vsel %vm1840_vm1, %v1731_v10, 0.0  ;;  %1652 = vmatpush.msrb.mxu2 %v3625_v46 }
 0x248   : > { %v3731_v40 = vadd.f32 %v1844_v11, %v1469_v0  ;;  %1668 = vmatmul.f32.gmra.mxu3 %v3379_v1  ;;  %v4205_v11 = vld [vmem:[#allocation42_spill] sm:$0xff] }
 0x249   : > { %v1276_v31 = vpop.f32.mrf.mxu2  ;;  %1653 = vmatpush.msrb.mxu2 %v3629_v28  ;;  %v3745_v28 = vpop.f32.mrf.mxu0 }
 0x24a   : > { %v1277_v39 = vadd.f32 %v1276_v31, %v1212_v55  ;;  %v1221_v55 = vadd.f32 %v4206_v15, %v4205_v11 }
 0x24b   : > { %v1406_v27 = vpop.f32.mrf.mxu3  ;;  %1654 = vmatpush.msrb.mxu2 %v3635_v14 }
 0x24c   : > { %v1732_v62 = vrot.slane %v1277_v39, 7  ;;  %v1407_v53 = vadd.f32 %v1406_v27, %v3610_v51  ;;  %v4207_v39 = vld [vmem:[#allocation39_spill] sm:$0xff] }
 0x24d   : > { %1655 = vmatpush.msrb.mxu2 %v3642_v21 }
 0x24e   : > { %v1472_v46 = vadd.f32 %v1471_v22, %v1407_v53  ;;  %v1733_v2 = vsel %vm1726_vm0, %v1730_v20, %v1732_v62  ;;  %1538 = vmatmul.f32.gmra.mxu2 %v3347_v32  ;;  %v1480_v22 = vpop.f32.mrf.mxu1 }
 0x250   : > { %v3742_v4 = vadd.f32 %v1733_v2, %v1472_v46  ;;  %1671 = vmatmul.f32.gmra.mxu3 %v3385_v6 }
 0x251   : > { %v1279_v14 = vpop.f32.mrf.mxu2  ;;  %v3757_v20 = vpop.f32.mrf.mxu0 }
 0x252   : > { %v1280_v43 = vadd.f32 %v1279_v14, %v1215_v5  ;;  %v4208_v14 = vld [vmem:[#allocation45_spill] sm:$0xff] }
 0x253   : > { %v1409_v24 = vpop.f32.mrf.mxu3 }
 0x254   : > { %v1734_v51 = vrot.slane %v1280_v43, 7  ;;  %v1410_v21 = vadd.f32 %v1409_v24, %v3639_v57  ;;  %v4209_v43 = vld [vmem:[#allocation48_spill] sm:$0xff] }
 0x255   : > { %v1224_v24 = vadd.f32 %v4209_v43, %v4208_v14 }
 0x256   : > { %v1735_v29 = vsel %vm1726_vm0, %v1732_v62, %v1734_v51  ;;  %v1475_v35 = vadd.f32 %v1474_v33, %v1410_v21  ;;  %1541 = vmatmul.f32.gmra.mxu2 %v3353_v38  ;;  %v1483_v0 = vpop.f32.mrf.mxu1  ;;  %v4210_v21 = vld [vmem:[#allocation40_spill] sm:$0xff] }
 0x257   : > { %v1846_v7 = vsel %vm1840_vm1, %v1735_v29, 0.0 }
 0x258   : > { %v3754_v60 = vadd.f32 %v1846_v7, %v1475_v35  ;;  %1674 = vmatmul.f32.gmra.mxu3 %v4204_v23 }
 0x259   : > { %v1282_v52 = vpop.f32.mrf.mxu2 }
 0x25a   : > { %v1283_v61 = vadd.f32 %v1282_v52, %v1218_v42 }
 0x25b   : > { %v1412_v57 = vpop.f32.mrf.mxu3 }
 0x25c   : > { %v1736_v34 = vrot.slane %v1283_v61, 7  ;;  %v1413_v33 = vadd.f32 %v1412_v57, %v3657_v50  ;;  %v3768_v50 = vpop.f32.mrf.mxu0  ;;  %v4211_v61 = vld [vmem:[#allocation47_spill] sm:$0xff] }
 0x25d   : > { %v4212_v57 = vld [vmem:[#allocation51_spill] sm:$0xff] }
 0x25e   : > { %v1478_v10 = vadd.f32 %v1477_v9, %v1413_v33  ;;  %v1737_v38 = vsel %vm1726_vm0, %v1734_v51, %v1736_v34  ;;  %1544 = vmatmul.f32.gmra.mxu2 %v3363_v48  ;;  %v1486_v29 = vpop.f32.mrf.mxu1 }
 0x260   : > { %v3764_v31 = vadd.f32 %v1737_v38, %v1478_v10  ;;  %1677 = vmatmul.f32.gmra.mxu3 %v4207_v39  ;;  %v4213_v10 = vld [vmem:[#allocation41_spill] sm:$0xff] }
 0x261   : > { %v1285_v27 = vpop.f32.mrf.mxu2 }
 0x262   : > { %v1286_v62 = vadd.f32 %v1285_v27, %v1221_v55 }
 0x263   : > { %v1415_v53 = vpop.f32.mrf.mxu3 }
 0x264   : > { %v1738_v46 = vrot.slane %v1286_v62, 7  ;;  %v1416_v2 = vadd.f32 %v1415_v53, %v3688_v18  ;;  %v1368_v52 = vpop.f32.mrf.mxu0  ;;  %v4214_v53 = vld [vmem:[#allocation49_spill] sm:$0xff] }
 0x266   : > { %v1739_v9 = vsel %vm1726_vm0, %v1736_v34, %v1738_v46  ;;  %v1481_v5 = vadd.f32 %v1480_v22, %v1416_v2  ;;  %1547 = vmatmul.f32.gmra.mxu2 %v3373_v59  ;;  %v1227_v34 = vadd.f32 %v4212_v57, %v4211_v61  ;;  %v1489_v15 = vpop.f32.mrf.mxu1 }
 0x267   : > { %v1848_v48 = vsel %vm1840_vm1, %v1739_v9, 0.0 }
 0x268   : > { %v3776_v51 = vadd.f32 %v1848_v48, %v1481_v5  ;;  %1680 = vmatmul.f32.gmra.mxu3 %v4210_v21 }
 0x269   : > { %v1288_v35 = vpop.f32.mrf.mxu2 }
 0x26a   : > { %v1289_v18 = vadd.f32 %v1288_v35, %v1224_v24 }
 0x26b   : > { %v1418_v7 = vpop.f32.mrf.mxu3 }
 0x26c   : > { %v1740_v17 = vrot.slane %v1289_v18, 7  ;;  %v1419_v42 = vadd.f32 %v1418_v7, %v3702_v49  ;;  %v1371_v9 = vpop.f32.mrf.mxu0  ;;  %v4215_v18 = vld [vmem:[#allocation50_spill] sm:$0xff] }
 0x26e   : > { %v1484_v22 = vadd.f32 %v1483_v0, %v1419_v42  ;;  %v1741_v59 = vsel %vm1726_vm0, %v1738_v46, %v1740_v17  ;;  %1550 = vmatmul.f32.gmra.mxu2 %v3379_v1  ;;  %v1230_v46 = vadd.f32 %v3644_v41, %v4214_v53  ;;  %v1492_v24 = vpop.f32.mrf.mxu1 }
 0x270   : > { %v3784_v33 = vadd.f32 %v1741_v59, %v1484_v22  ;;  %1683 = vmatmul.f32.gmra.mxu3 %v4213_v10 }
 0x271   : > { %v1291_v38 = vpop.f32.mrf.mxu2 }
 0x272   : > { %v1292_v11 = vadd.f32 %v1291_v38, %v1227_v34 }
 0x273   : > { %v1421_v55 = vpop.f32.mrf.mxu3 }
 0x274   : > { %v1742_v27 = vrot.slane %v1292_v11, 7  ;;  %v1422_v49 = vadd.f32 %v1421_v55, %v3724_v63 }
 0x276   : > { %v1487_v0 = vadd.f32 %v1486_v29, %v1422_v49  ;;  %v1743_v62 = vsel %vm1726_vm0, %v1740_v17, %v1742_v27  ;;  %1553 = vmatmul.f32.gmra.mxu2 %v3385_v6  ;;  %v1374_v17 = vpop.f32.mrf.mxu0  ;;  %v1495_v57 = vpop.f32.mrf.mxu1 }
 0x277   : > { %v1850_v1 = vsel %vm1840_vm1, %v1743_v62, 0.0 }
 0x278   : > { %v3794_v2 = vadd.f32 %v1850_v1, %v1487_v0  ;;  %1686 = vmatmul.f32.gmra.mxu3 %v3452_v8 }
 0x279   : > { %v1294_v5 = vpop.f32.mrf.mxu2 }
 0x27a   : > { %v1295_v48 = vadd.f32 %v1294_v5, %v1230_v46 }
 0x27b   : > { %v1424_v14 = vpop.f32.mrf.mxu3 }
 0x27c   : > { %v1744_v63 = vrot.slane %v1295_v48, 7  ;;  %v1425_v43 = vadd.f32 %v1424_v14, %v3745_v28 }
 0x27e   : > { %v1490_v29 = vadd.f32 %v1489_v15, %v1425_v43  ;;  %v1745_v6 = vsel %vm1726_vm0, %v1742_v27, %v1744_v63  ;;  %1556 = vmatmul.f32.gmra.mxu2 %v4204_v23  ;;  %v1377_v27 = vpop.f32.mrf.mxu0  ;;  %v1498_v62 = vpop.f32.mrf.mxu1 }
 0x280   : > { %v3800_v35 = vadd.f32 %v1745_v6, %v1490_v29  ;;  %1689 = vmatmul.f32.gmra.mxu3 %v3471_v30 }
 0x281   : > { %v1297_v41 = vpop.f32.mrf.mxu2 }
 0x282   : > { %v1298_v7 = vadd.f32 %v1297_v41, %v4215_v18 }
 0x283   : > { %v1427_v42 = vpop.f32.mrf.mxu3 }
 0x284   : > { %v1746_v22 = vrot.slane %v1298_v7, 7  ;;  %v1428_v59 = vadd.f32 %v1427_v42, %v3757_v20 }
 0x286   : > { %v1493_v61 = vadd.f32 %v1492_v24, %v1428_v59  ;;  %v1747_v28 = vsel %vm1726_vm0, %v1744_v63, %v1746_v22  ;;  %1559 = vmatmul.f32.gmra.mxu2 %v4207_v39  ;;  %v3822_v14 = vpop.f32.mrf.mxu0  ;;  %v1501_v24 = vpop.f32.mrf.mxu1 }
 0x287   : > { %v1852_v23 = vsel %vm1840_vm1, %v1747_v28, 0.0 }
 0x288   : > { %v3809_v34 = vadd.f32 %v1852_v23, %v1493_v61  ;;  %1692 = vmatmul.f32.gmra.mxu3 %v3479_v37 }
 0x289   : > { %v1300_v38 = vpop.f32.mrf.mxu2 }
 0x28a   : > { %v1301_v11 = vadd.f32 %v1300_v38, %v3633_v44 }
 0x28b   : > { %v1430_v15 = vpop.f32.mrf.mxu3 }
 0x28c   : > { %v1748_v55 = vrot.slane %v1301_v11, 7  ;;  %v1431_v20 = vadd.f32 %v1430_v15, %v3768_v50 }
 0x28e   : > { %v1496_v49 = vadd.f32 %v1495_v57, %v1431_v20  ;;  %v1749_v0 = vsel %vm1726_vm0, %v1746_v22, %v1748_v55  ;;  %1562 = vmatmul.f32.gmra.mxu2 %v4210_v21  ;;  %v1595_v7 = vpop.f32.mrf.mxu0  ;;  %v1504_v22 = vpop.f32.mrf.mxu1 }
 0x290   : > { %v3816_v39 = vadd.f32 %v1749_v0, %v1496_v49  ;;  %1695 = vmatmul.f32.gmra.mxu3 %v3486_v45 }
 0x291   : > { %v1303_v1 = vpop.f32.mrf.mxu2 }
 0x292   : > { %v1304_v53 = vadd.f32 %v1303_v1, %v3652_v16  ;;  %v1959_v1 = vld [vmem:[#allocation12 + $0x78] sm:$0xff] }
 0x293   : > { %v1433_v46 = vpop.f32.mrf.mxu3  ;;  %1964 = vmatpush.msrb.mxu1 %v1959_v1 }
 0x294   : > { %v1750_v44 = vrot.slane %v1304_v53, 7  ;;  %v1434_v5 = vadd.f32 %v1433_v46, %v1368_v52 }
 0x296   : > { %v1751_v48 = vsel %vm1726_vm0, %v1748_v55, %v1750_v44  ;;  %v1499_v50 = vadd.f32 %v1498_v62, %v1434_v5  ;;  %1565 = vmatmul.f32.gmra.mxu2 %v4213_v10  ;;  %v1598_v11 = vpop.f32.mrf.mxu0  ;;  %v1507_v20 = vpop.f32.mrf.mxu1  ;;  %v1957_v5 = vld [vmem:[#allocation12 + $0x68] sm:$0xff] }
 0x297   : > { %v1854_v21 = vsel %vm1840_vm1, %v1751_v48, 0.0 }
 0x298   : > { %v3826_v63 = vadd.f32 %v1854_v21, %v1499_v50  ;;  %1698 = vmatmul.f32.gmra.mxu3 %v3550_v47 }
 0x299   : > { %v1306_v43 = vpop.f32.mrf.mxu2 }
 0x29a   : > { %v1307_v16 = vadd.f32 %v1306_v43, %v3665_v26 }
 0x29b   : > { %v1436_v29 = vpop.f32.mrf.mxu3 }
 0x29c   : > { %v1752_v52 = vrot.slane %v1307_v16, 7  ;;  %v1437_v6 = vadd.f32 %v1436_v29, %v1371_v9  ;;  %v3864_v16 = vadd.s32 8, %v3715_v58 }
 0x29e   : > { %v1502_v41 = vadd.f32 %v1501_v24, %v1437_v6  ;;  %v1753_v18 = vsel %vm1726_vm0, %v1750_v44, %v1752_v52  ;;  %1568 = vmatmul.f32.gmra.mxu2 %v3452_v8  ;;  %v1601_v12 = vpop.f32.mrf.mxu0  ;;  %vm1875_vm3 = vcmp.lt.s32.totalorder %v3864_v16, 15  ;;  %v1956_v6 = vld [vmem:[#allocation12 + $0x60] sm:$0xff] }
 0x2a0   : > { %v3832_v10 = vadd.f32 %v1753_v18, %v1502_v41  ;;  %1701 = vmatmul.f32.gmra.mxu3 %v3566_v13  ;;  %v4216_v13 = vld [vmem:[#allocation43_spill] sm:$0xff] }
 0x2a1   : > { %v1309_v42 = vpop.f32.mrf.mxu2  ;;  %v1398_v38 = vadd.f32 %v3690_v25, %v4216_v13 }
 0x2a2   : > { %v1310_v47 = vadd.f32 %v1309_v42, %v3673_v56 }
 0x2a3   : > { %v1439_v59 = vpop.f32.mrf.mxu3  ;;  %v1463_v49 = vadd.f32 %v3661_v36, %v1398_v38 }
 0x2a4   : > { %v1754_v26 = vrot.slane %v1310_v47, 7  ;;  %v1440_v61 = vadd.f32 %v1439_v59, %v1374_v17 }
 0x2a6   : > { %v1755_v28 = vsel %vm1726_vm0, %v1752_v52, %v1754_v26  ;;  %v1505_v9 = vadd.f32 %v1504_v22, %v1440_v61  ;;  %1571 = vmatmul.f32.gmra.mxu2 %v3471_v30  ;;  %v1604_v48 = vpop.f32.mrf.mxu0 }
 0x2a7   : > { %v1856_v8 = vsel %vm1840_vm1, %v1755_v28, 0.0 }
 0x2a8   : > { %v3840_v57 = vadd.f32 %v1856_v8, %v1505_v9 }
 0x2a9   : > { %v1312_v23 = vpop.f32.mrf.mxu2 }
 0x2aa   : > { %v1313_v56 = vadd.f32 %v1312_v23, %v3679_v3 }
 0x2ab   : > { %v1442_v15 = vpop.f32.mrf.mxu3 }
 0x2ac   : > { %v1709_v55 = vrot.slane %v1313_v56, 7  ;;  %v1443_v17 = vadd.f32 %v1442_v15, %v1377_v27 }
 0x2ae   : > { %v1773_v30 = vsel %vm1726_vm0, %v1709_v55, %v1727_v19  ;;  %v1508_v0 = vadd.f32 %v1507_v20, %v1443_v17  ;;  %v1756_v62 = vsel %vm1726_vm0, %v1754_v26, %v1709_v55  ;;  %1633 = vmatmul.f32.vlgmr.msra.gmra.mxu2 %v3479_v37  ;;  %v1958_v19 = vld [vmem:[#allocation12 + $0x70] sm:$0xff]  ;;  %v1607_v41 = vpop.f32.mrf.mxu0  ;;  %v1955_v26 = vld [vmem:[#allocation12 + $0x58] sm:$0xff] }
 0x2af   : > { %v1842_v3 = vsel %vm1840_vm1, %v1773_v30, 0.0  ;;  %1965 = vmatpush.msrb.mxu1 %v1958_v19 }
 0x2b0   : > { %v3853_v25 = vadd.f32 %v1842_v3, %v1463_v49  ;;  %v3855_v27 = vadd.f32 %v1756_v62, %v1508_v0  ;;  %v1953_v62 = vld [vmem:[#allocation12 + $0x48] sm:$0xff] }
 0x2b1   : > { %v3857_v53 = vpop.f32.mrf.mxu2  ;;  %1966 = vmatpush.msrb.mxu1 %v1957_v5  ;;  %v1952_v5 = vld [vmem:[#allocation12 + $0x40] sm:$0xff] }
 0x2b3   : > { %v1660_v36 = vpop.f32.mrf.mxu3  ;;  %1967 = vmatpush.msrb.mxu1 %v1956_v6 }
 0x2b5   : > { %1968 = vmatpush.msrb.mxu1 %v1955_v26 }
 0x2b6   : > { %1636 = vmatmul.f32.gmra.mxu2 %v3486_v45  ;;  %v1610_v23 = vpop.f32.mrf.mxu0 }
 0x2b9   : > { %v1530_v46 = vpop.f32.mrf.mxu2 }
 0x2ba   : > { %v1596_v37 = vadd.f32 %v1595_v7, %v1530_v46 }
 0x2bb   : > { %v1663_v44 = vpop.f32.mrf.mxu3 }
 0x2bc   : > { %v3861_v21 = vadd.f32 %v1660_v36, %v1596_v37 }
 0x2be   : > { %1656 = vmatmul.f32.vlgmr.msrb.gmra.mxu2 %v3347_v32  ;;  %v1792_v45 = vrot.slane %v3861_v21, 1  ;;  %v1613_v30 = vpop.f32.mrf.mxu0 }
 0x2c1   : > { %v1533_v50 = vpop.f32.mrf.mxu2 }
 0x2c2   : > { %v1599_v43 = vadd.f32 %v1598_v11, %v1533_v50 }
 0x2c3   : > { %v1666_v24 = vpop.f32.mrf.mxu3 }
 0x2c4   : > { %v1664_v29 = vadd.f32 %v1663_v44, %v1599_v43 }
 0x2c6   : > { %v1794_v52 = vrot.slane %v1664_v29, 1  ;;  %v1616_v37 = vpop.f32.mrf.mxu0 }
 0x2c8   : > { %v1795_v32 = vsel %vm1790_vm2, %v1792_v45, %v1794_v52 }
 0x2c9   : > { %v1536_v18 = vpop.f32.mrf.mxu2  ;;  %v1877_v58 = vsel %vm1875_vm3, %v1795_v32, 0.0  ;;  %v1951_v32 = vld [vmem:[#allocation12 + $0x38] sm:$0xff] }
 0x2ca   : > { %v1602_v7 = vadd.f32 %v1601_v12, %v1536_v18  ;;  %v3874_v42 = vadd.f32 %v1877_v58, %v3712_v54  ;;  %v1954_v54 = vld [vmem:[#allocation12 + $0x50] sm:$0xff] }
 0x2cb   : > { %v1669_v47 = vpop.f32.mrf.mxu3  ;;  %1969 = vmatpush.msrb.mxu1 %v1954_v54 }
 0x2cc   : > { %v1667_v22 = vadd.f32 %v1666_v24, %v1602_v7 }
 0x2cd   : > { %1970 = vmatpush.msrb.mxu1 %v1953_v62 }
 0x2ce   : > { %v1796_v59 = vrot.slane %v1667_v22, 1 }
 0x2cf   : > { %1971 = vmatpush.msrb.mxu1 %v1952_v5 }
 0x2d0   : > { %v1797_v61 = vsel %vm1790_vm2, %v1794_v52, %v1796_v59 }
 0x2d1   : > { %v1539_v28 = vpop.f32.mrf.mxu2  ;;  %v3878_v9 = vadd.f32 %v3731_v40, %v1797_v61  ;;  %1972 = vmatpush.msrb.mxu1 %v1951_v32  ;;  %v1946_v32 = vld [vmem:[#allocation12 + $0x10] sm:$0xff] }
 0x2d2   : > { %v1605_v8 = vadd.f32 %v1604_v48, %v1539_v28 }
 0x2d3   : > { %v1672_v13 = vpop.f32.mrf.mxu3 }
 0x2d4   : > { %v1670_v38 = vadd.f32 %v1669_v47, %v1605_v8 }
 0x2d6   : > { %v1798_v56 = vrot.slane %v1670_v38, 1 }
 0x2d8   : > { %v1799_v11 = vsel %vm1790_vm2, %v1796_v59, %v1798_v56 }
 0x2d9   : > { %v1542_v15 = vpop.f32.mrf.mxu2  ;;  %v1879_v55 = vsel %vm1875_vm3, %v1799_v11, 0.0  ;;  %v1949_v11 = vld [vmem:[#allocation12 + $0x28] sm:$0xff] }
 0x2da   : > { %v1608_v17 = vadd.f32 %v1607_v41, %v1542_v15  ;;  %v3884_v20 = vadd.f32 %v1879_v55, %v3742_v4  ;;  %v1619_v41 = vpop.f32.mrf.mxu0 }
 0x2db   : > { %v1675_v49 = vpop.f32.mrf.mxu3 }
 0x2dc   : > { %v1673_v40 = vadd.f32 %v1672_v13, %v1608_v17 }
 0x2de   : > { %v1800_v0 = vrot.slane %v1673_v40, 1 }
 0x2e0   : > { %v1801_v1 = vsel %vm1790_vm2, %v1798_v56, %v1800_v0 }
 0x2e1   : > { %v1545_v3 = vpop.f32.mrf.mxu2  ;;  %v3888_v36 = vadd.f32 %v3754_v60, %v1801_v1 }
 0x2e2   : > { %v1611_v12 = vadd.f32 %v1610_v23, %v1545_v3  ;;  %v1622_v13 = vpop.f32.mrf.mxu0  ;;  %v1947_v3 = vld [vmem:[#allocation12 + $0x18] sm:$0xff] }
 0x2e3   : > { %v1678_v19 = vpop.f32.mrf.mxu3 }
 0x2e4   : > { %v1676_v46 = vadd.f32 %v1675_v49, %v1611_v12  ;;  %v1948_v49 = vld [vmem:[#allocation12 + $0x20] sm:$0xff] }
 0x2e6   : > { %v1802_v44 = vrot.slane %v1676_v46, 1 }
 0x2e8   : > { %v1803_v4 = vsel %vm1790_vm2, %v1800_v0, %v1802_v44 }
 0x2e9   : > { %v1548_v48 = vpop.f32.mrf.mxu2  ;;  %v1881_v50 = vsel %vm1875_vm3, %v1803_v4, 0.0 }
 0x2ea   : > { %v1614_v43 = vadd.f32 %v1613_v30, %v1548_v48  ;;  %v3894_v24 = vadd.f32 %v1881_v50, %v3764_v31  ;;  %v1950_v31 = vld [vmem:[#allocation12 + $0x30] sm:$0xff]  ;;  %v1625_v30 = vpop.f32.mrf.mxu0 }
 0x2eb   : > { %v1681_v29 = vpop.f32.mrf.mxu3  ;;  %1973 = vmatpush.msrb.mxu1 %v1950_v31 }
 0x2ec   : > { %v1679_v60 = vadd.f32 %v1678_v19, %v1614_v43 }
 0x2ed   : > { %1974 = vmatpush.msrb.mxu1 %v1949_v11 }
 0x2ee   : > { %v1804_v52 = vrot.slane %v1679_v60, 1 }
 0x2ef   : > { %1975 = vmatpush.msrb.mxu1 %v1948_v49 }
 0x2f0   : > { %v1805_v6 = vsel %vm1790_vm2, %v1802_v44, %v1804_v52 }
 0x2f1   : > { %v1551_v18 = vpop.f32.mrf.mxu2  ;;  %v3898_v58 = vadd.f32 %v3776_v51, %v1805_v6  ;;  %1976 = vmatpush.msrb.mxu1 %v1947_v3 }
 0x2f2   : > { %v1617_v7 = vadd.f32 %v1616_v37, %v1551_v18  ;;  %v1628_v37 = vpop.f32.mrf.mxu0 }
 0x2f3   : > { %v1684_v47 = vpop.f32.mrf.mxu3  ;;  %1977 = vmatpush.msrb.mxu1 %v1946_v32 }
 0x2f4   : > { %v1682_v22 = vadd.f32 %v1681_v29, %v1617_v7 }
 0x2f6   : > { %v1806_v59 = vrot.slane %v1682_v22, 1 }
 0x2f8   : > { %v1807_v26 = vsel %vm1790_vm2, %v1804_v52, %v1806_v59 }
 0x2f9   : > { %v1554_v61 = vpop.f32.mrf.mxu2  ;;  %v1883_v28 = vsel %vm1875_vm3, %v1807_v26, 0.0 }
 0x2fa   : > { %v1620_v8 = vadd.f32 %v1619_v41, %v1554_v61  ;;  %v3904_v23 = vadd.f32 %v1883_v28, %v3784_v33  ;;  %v1631_v6 = vpop.f32.mrf.mxu0 }
 0x2fb   : > { %v1687_v51 = vpop.f32.mrf.mxu3 }
 0x2fc   : > { %v1685_v38 = vadd.f32 %v1684_v47, %v1620_v8  ;;  %v1944_v8 = vld [vmem:[#allocation12] sm:$0xff] }
 0x2fe   : > { %v1808_v56 = vrot.slane %v1685_v38, 1 }
 0x300   : > { %v1809_v54 = vsel %vm1790_vm2, %v1806_v59, %v1808_v56  ;;  %v1945_v59 = vld [vmem:[#allocation12 + $0x8] sm:$0xff] }
 0x301   : > { %v1557_v15 = vpop.f32.mrf.mxu2  ;;  %v3908_v55 = vadd.f32 %v3794_v2, %v1809_v54  ;;  %1978 = vmatpush.msrb.mxu1 %v1945_v59 }
 0x302   : > { %v1623_v17 = vadd.f32 %v1622_v13, %v1557_v15 }
 0x303   : > { %v1690_v33 = vpop.f32.mrf.mxu3  ;;  %1979 = vmatpush.msrb.mxu1 %v1944_v8 }
 0x304   : > { %v1688_v40 = vadd.f32 %v1687_v51, %v1623_v17 }
 0x306   : > { %v1810_v0 = vrot.slane %v1688_v40, 1 }
 0x308   : > { %v1811_v62 = vsel %vm1790_vm2, %v1808_v56, %v1810_v0 }
 0x309   : > { %v1560_v1 = vpop.f32.mrf.mxu2  ;;  %v1885_v12 = vsel %vm1875_vm3, %v1811_v62, 0.0 }
 0x30a   : > { %v1626_v19 = vadd.f32 %v1625_v30, %v1560_v1  ;;  %v3914_v46 = vadd.f32 %v1885_v12, %v3800_v35 }
 0x30b   : > { %v1693_v5 = vpop.f32.mrf.mxu3 }
 0x30c   : > { %v1691_v2 = vadd.f32 %v1690_v33, %v1626_v19 }
 0x30e   : > { %v1812_v44 = vrot.slane %v1691_v2, 1 }
 0x310   : > { %v1813_v4 = vsel %vm1790_vm2, %v1810_v0, %v1812_v44  ;;  %v1593_v0 = vadd.f32 %v3822_v14, %v3857_v53  ;;  %v2524_v14 = vld [vmem:[%s4217_s22] ss:$0 sm:$0xff] }
 0x311   : > { %v1563_v48 = vpop.f32.mrf.mxu2  ;;  %v3918_v50 = vadd.f32 %v3809_v34, %v1813_v4  ;;  %v1913_v21 = vadd.f32 %v2524_v14, %v3874_v42  ;;  %v1915_v16 = vadd.f32 %v2524_v14, %v3884_v20  ;;  %v1918_v42 = vadd.f32 %v2524_v14, %v3898_v58 }
 0x312   : > { %v1629_v43 = vadd.f32 %v1628_v37, %v1563_v48  ;;  %v1916_v48 = vadd.f32 %v2524_v14, %v3888_v36  ;;  %v1920_v20 = vadd.f32 %v2524_v14, %v3908_v55  ;;  %v1921_v36 = vadd.f32 %v2524_v14, %v3914_v46 }
 0x313   : > { %v1696_v47 = vpop.f32.mrf.mxu3  ;;  %v1929_v4 = vmax.f32 %v1913_v21, 0.0 }
 0x314   : > { %v1694_v29 = vadd.f32 %v1693_v5, %v1629_v43  ;;  %v1932_v43 = vmax.f32 %v1916_v48, 0.0  ;;  %v1936_v32 = vmax.f32 %v1920_v20, 0.0 }
 0x316   : > { %v1814_v60 = vrot.slane %v1694_v29, 1 }
 0x318   : > { %v1815_v52 = vsel %vm1790_vm2, %v1812_v44, %v1814_v60 }
 0x319   : > { %v1566_v41 = vpop.f32.mrf.mxu2  ;;  %v1887_v35 = vsel %vm1875_vm3, %v1815_v52, 0.0 }
 0x31a   : > { %v1632_v18 = vadd.f32 %v1631_v6, %v1566_v41  ;;  %v3924_v7 = vadd.f32 %v1887_v35, %v3816_v39  ;;  %v1937_v6 = vmax.f32 %v1921_v36, 0.0 }
 0x31b   : > { %v1699_v13 = vpop.f32.mrf.mxu3 }
 0x31c   : > { %v1697_v22 = vadd.f32 %v1696_v47, %v1632_v18  ;;  %v1923_v58 = vadd.f32 %v2524_v14, %v3924_v7  ;;  %v3964_v7 = vld [vmem:[%s4218_s2] ss:$0 sm:$0xff] }
 0x31e   : > { %v1816_v34 = vrot.slane %v1697_v22, 1  ;;  %v1939_v35 = vmax.f32 %v1923_v58, 0.0 }
 0x320   : > { %v1817_v26 = vsel %vm1790_vm2, %v1814_v60, %v1816_v34  ;;  %v1934_v60 = vmax.f32 %v1918_v42, 0.0 }
 0x321   : > { %v1569_v31 = vpop.f32.mrf.mxu2  ;;  %v3928_v61 = vadd.f32 %v3826_v63, %v1817_v26 }
 0x323   : > { %v1702_v40 = vpop.f32.mrf.mxu3 }
 0x329   : > { %v1572_v28 = vpop.f32.mrf.mxu2 }
 0x331   : > { %v1634_v38 = vpop.f32.mrf.mxu2 }
 0x332   : > { %v1635_v51 = vadd.f32 %v1634_v38, %v1569_v31  ;;  %v2526_v31 = vld [vmem:[%s3225_s7] sm:$0xff] }
 0x334   : > { %v1700_v56 = vadd.f32 %v1699_v13, %v1635_v51  ;;  %v2527_v13 = vld [vmem:[%s3225_s7 + $0x8] sm:$0xff] }
 0x336   : > { %v1818_v39 = vrot.slane %v1700_v56, 1 }
 0x338   : > { %v1819_v11 = vsel %vm1790_vm2, %v1816_v34, %v1818_v39 }
 0x339   : > { %v1637_v54 = vpop.f32.mrf.mxu2  ;;  %v1889_v15 = vsel %vm1875_vm3, %v1819_v11, 0.0 }
 0x33a   : > { %v1638_v17 = vadd.f32 %v1637_v54, %v1572_v28  ;;  %v1905_v49 = vadd.f32 %v1889_v15, %v3832_v10 }
 0x33c   : > { %v1703_v63 = vadd.f32 %v1702_v40, %v1638_v17  ;;  %v1925_v55 = vadd.f32 %v2524_v14, %v1905_v49  ;;  %v2529_v17 = vld [vmem:[%s3225_s7 + $0x18] sm:$0xff] }
 0x33e   : > { %v1820_v30 = vrot.slane %v1703_v63, 1  ;;  %v1941_v47 = vmax.f32 %v1925_v55, 0.0 }
 0x340   : > { %v1821_v33 = vsel %vm1790_vm2, %v1818_v39, %v1820_v30  ;;  %v2528_v39 = vld [vmem:[%s3225_s7 + $0x10] sm:$0xff] }
 0x341   : > { %v1657_v62 = vpop.f32.mrf.mxu2  ;;  %v1906_v1 = vadd.f32 %v3840_v57, %v1821_v33 }
 0x342   : > { %v1658_v3 = vadd.f32 %v1657_v62, %v1593_v0 }
 0x343   : > { %v1926_v46 = vadd.f32 %v2524_v14, %v1906_v1  ;;  %v2531_v1 = vld [vmem:[%s3225_s7 + $0x28] sm:$0xff] }
 0x344   : > { %v1791_v12 = vrot.slane %v1658_v3, 1 }
 0x345   : > { %v1942_v22 = vmax.f32 %v1926_v46, 0.0 }
 0x346   : > { %v1793_v19 = vsel %vm1790_vm2, %v1791_v12, %v1792_v45  ;;  %v1839_v2 = vsel %vm1790_vm2, %v1820_v30, %v1791_v12  ;;  %v1914_v45 = vadd.f32 %v2524_v14, %v3878_v9  ;;  %v1919_v9 = vadd.f32 %v2524_v14, %v3904_v23  ;;  %v2530_v30 = vld [vmem:[%s3225_s7 + $0x20] sm:$0xff] }
 0x347   : > { %v1891_v10 = vsel %vm1875_vm3, %v1839_v2, 0.0  ;;  %v1892_v44 = vadd.f32 %v3853_v25, %v1793_v19  ;;  %v1931_v25 = vmax.f32 %v1915_v16, 0.0  ;;  %v1924_v23 = vadd.f32 %v2524_v14, %v3928_v61  ;;  %v2532_v2 = vld [vmem:[%s3225_s7 + $0x30] sm:$0xff] }
 0x348   : > { %v1907_v53 = vadd.f32 %v1891_v10, %v3855_v27  ;;  %v1930_v5 = vmax.f32 %v1914_v45, 0.0  ;;  %v1917_v27 = vadd.f32 %v2524_v14, %v3894_v24  ;;  %v1935_v52 = vmax.f32 %v1919_v9, 0.0 }
 0x349   : > { %v1912_v57 = vadd.f32 %v2524_v14, %v1892_v44  ;;  %v1922_v24 = vadd.f32 %v2524_v14, %v3918_v50  ;;  %v1940_v18 = vmax.f32 %v1924_v23, 0.0 }
 0x34a   : > { %v1933_v29 = vmax.f32 %v1917_v27, 0.0  ;;  %v1927_v50 = vadd.f32 %v2524_v14, %v1907_v53  ;;  %v2533_v53 = vld [vmem:[%s3225_s7 + $0x38] sm:$0xff] }
 0x34b   : > { %v1928_v37 = vmax.f32 %v1912_v57, 0.0  ;;  %v1938_v41 = vmax.f32 %v1922_v24, 0.0 }
 0x34c   : > { %v1943_v34 = vmax.f32 %v1927_v50, 0.0 }
 0x34d   : > { %1980 = vmatmul.f32.vlgmr.msrb.gmra.mxu1 %v1928_v37 }
 0x355   : > { %1983 = vmatmul.f32.gmra.mxu1 %v1929_v4  ;;  %v2534_v4 = vld [vmem:[%s3225_s7 + $0x40] sm:$0xff] }
 0x35d   : > { %1986 = vmatmul.f32.gmra.mxu1 %v1930_v5 }
 0x365   : > { %1989 = vmatmul.f32.gmra.mxu1 %v1931_v25  ;;  %v2535_v25 = vld [vmem:[%s3225_s7 + $0x48] sm:$0xff] }
 0x36d   : > { %1992 = vmatmul.f32.gmra.mxu1 %v1932_v43 }
 0x375   : > { %1995 = vmatmul.f32.gmra.mxu1 %v1933_v29  ;;  %v2536_v29 = vld [vmem:[%s3225_s7 + $0x50] sm:$0xff] }
 0x37d   : > { %1998 = vmatmul.f32.gmra.mxu1 %v1934_v60 }
 0x385   : > { %2001 = vmatmul.f32.gmra.mxu1 %v1935_v52  ;;  %v2537_v52 = vld [vmem:[%s3225_s7 + $0x58] sm:$0xff] }
 0x38d   : > { %2004 = vmatmul.f32.gmra.mxu1 %v1936_v32 }
 0x395   : > { %2007 = vmatmul.f32.gmra.mxu1 %v1937_v6  ;;  %v2538_v6 = vld [vmem:[%s3225_s7 + $0x60] sm:$0xff] }
 0x39d   : > { %2010 = vmatmul.f32.gmra.mxu1 %v1938_v41 }
 0x3a5   : > { %2013 = vmatmul.f32.gmra.mxu1 %v1939_v35  ;;  %v2539_v35 = vld [vmem:[%s3225_s7 + $0x68] sm:$0xff] }
 0x3ad   : > { %2016 = vmatmul.f32.gmra.mxu1 %v1940_v18 }
 0x3b5   : > { %2019 = vmatmul.f32.gmra.mxu1 %v1941_v47  ;;  %v2540_v47 = vld [vmem:[%s3225_s7 + $0x70] sm:$0xff] }
 0x3bd   : > { %2022 = vmatmul.f32.gmra.mxu1 %v1942_v22 }
 0x3c5   : > { %2025 = vmatmul.f32.gmra.mxu1 %v1943_v34  ;;  %v2541_v34 = vld [vmem:[%s3225_s7 + $0x78] sm:$0xff] }
 0x3ca   : > { %v1981_v59 = vpop.f32.mrf.mxu1 }
 0x3cb   : > { %v1982_v26 = vadd.f32 %v3964_v7, %v1981_v59 }
 0x3cd   : > { %v2029_v61 = vadd.f32 %v2526_v31, %v1982_v26 }
 0x3cf   : > { %2045 = vst [vmem:[%s3970_s17] sm:$0xff] %v2029_v61 }
 0x3d2   : > { %v1984_v28 = vpop.f32.mrf.mxu1 }
 0x3d3   : > { %v1985_v8 = vadd.f32 %v3964_v7, %v1984_v28 }
 0x3d5   : > { %v2030_v38 = vadd.f32 %v2527_v13, %v1985_v8 }
 0x3d7   : > { %2046 = vst [vmem:[%s3970_s17 + $0x8] sm:$0xff] %v2030_v38 }
 0x3da   : > { %v1987_v51 = vpop.f32.mrf.mxu1 }
 0x3db   : > { %v1988_v56 = vadd.f32 %v3964_v7, %v1987_v51 }
 0x3dd   : > { %v2031_v11 = vadd.f32 %v2528_v39, %v1988_v56 }
 0x3df   : > { %2047 = vst [vmem:[%s3970_s17 + $0x10] sm:$0xff] %v2031_v11 }
 0x3e2   : > { %v1990_v54 = vpop.f32.mrf.mxu1 }
 0x3e3   : > { %v1991_v15 = vadd.f32 %v3964_v7, %v1990_v54 }
 0x3e5   : > { %v2032_v49 = vadd.f32 %v2529_v17, %v1991_v15 }
 0x3e7   : > { %2048 = vst [vmem:[%s3970_s17 + $0x18] sm:$0xff] %v2032_v49 }
 0x3ea   : > { %v1993_v40 = vpop.f32.mrf.mxu1 }
 0x3eb   : > { %v1994_v63 = vadd.f32 %v3964_v7, %v1993_v40 }
 0x3ed   : > { %v2033_v0 = vadd.f32 %v2530_v30, %v1994_v63 }
 0x3ef   : > { %2049 = vst [vmem:[%s3970_s17 + $0x20] sm:$0xff] %v2033_v0 }
 0x3f2   : > { %v1996_v33 = vpop.f32.mrf.mxu1 }
 0x3f3   : > { %v1997_v62 = vadd.f32 %v3964_v7, %v1996_v33 }
 0x3f5   : > { %v2034_v3 = vadd.f32 %v2531_v1, %v1997_v62 }
 0x3f7   : > { %2050 = vst [vmem:[%s3970_s17 + $0x28] sm:$0xff] %v2034_v3 }
 0x3fa   : > { %v1999_v12 = vpop.f32.mrf.mxu1 }
 0x3fb   : > { %v2000_v19 = vadd.f32 %v3964_v7, %v1999_v12 }
 0x3fd   : > { %v2035_v10 = vadd.f32 %v2532_v2, %v2000_v19 }
 0x3ff   : > { %2051 = vst [vmem:[%s3970_s17 + $0x30] sm:$0xff] %v2035_v10 }
 0x402   : > { %v2002_v44 = vpop.f32.mrf.mxu1 }
 0x403   : > { %v2003_v14 = vadd.f32 %v3964_v7, %v2002_v44 }
 0x405   : > { %v2036_v57 = vadd.f32 %v2533_v53, %v2003_v14 }
 0x407   : > { %2052 = vst [vmem:[%s3970_s17 + $0x38] sm:$0xff] %v2036_v57 }
 0x40a   : > { %v2005_v37 = vpop.f32.mrf.mxu1 }
 0x40b   : > { %v2006_v21 = vadd.f32 %v3964_v7, %v2005_v37 }
 0x40d   : > { %v2037_v45 = vadd.f32 %v2534_v4, %v2006_v21 }
 0x40f   : > { %2053 = vst [vmem:[%s3970_s17 + $0x40] sm:$0xff] %v2037_v45 }
 0x412   : > { %v2008_v5 = vpop.f32.mrf.mxu1 }
 0x413   : > { %v2009_v16 = vadd.f32 %v3964_v7, %v2008_v5 }
 0x415   : > { %v2038_v48 = vadd.f32 %v2535_v25, %v2009_v16 }
 0x417   : > { %2054 = vst [vmem:[%s3970_s17 + $0x48] sm:$0xff] %v2038_v48 }
 0x41a   : > { %v2011_v43 = vpop.f32.mrf.mxu1 }
 0x41b   : > { %v2012_v27 = vadd.f32 %v3964_v7, %v2011_v43 }
 0x41d   : > { %v2039_v42 = vadd.f32 %v2536_v29, %v2012_v27 }
 0x41f   : > { %2055 = vst [vmem:[%s3970_s17 + $0x50] sm:$0xff] %v2039_v42 }
 0x422   : > { %v2014_v60 = vpop.f32.mrf.mxu1 }
 0x423   : > { %v2015_v9 = vadd.f32 %v3964_v7, %v2014_v60 }
 0x425   : > { %v2040_v20 = vadd.f32 %v2537_v52, %v2015_v9 }
 0x427   : > { %2056 = vst [vmem:[%s3970_s17 + $0x58] sm:$0xff] %v2040_v20 }
 0x42a   : > { %v2017_v32 = vpop.f32.mrf.mxu1 }
 0x42b   : > { %v2018_v36 = vadd.f32 %v3964_v7, %v2017_v32 }
 0x42d   : > { %v2041_v24 = vadd.f32 %v2538_v6, %v2018_v36 }
 0x42f   : > { %2057 = vst [vmem:[%s3970_s17 + $0x60] sm:$0xff] %v2041_v24 }
 0x432   : > { %v2020_v41 = vpop.f32.mrf.mxu1 }
 0x433   : > { %v2021_v58 = vadd.f32 %v3964_v7, %v2020_v41 }
 0x435   : > { %v2042_v23 = vadd.f32 %v2539_v35, %v2021_v58 }
 0x437   : > { %2058 = vst [vmem:[%s3970_s17 + $0x68] sm:$0xff] %v2042_v23 }
 0x43a   : > { %v2023_v18 = vpop.f32.mrf.mxu1 }
 0x43b   : > { %v2024_v55 = vadd.f32 %v3964_v7, %v2023_v18 }
 0x43d   : > { %v2043_v46 = vadd.f32 %v2540_v47, %v2024_v55 }
 0x43f   : > { %2059 = vst [vmem:[%s3970_s17 + $0x70] sm:$0xff] %v2043_v46 }
 0x442   : > { %v2026_v22 = vpop.f32.mrf.mxu1 }
 0x443   : > { %v2027_v50 = vadd.f32 %v3964_v7, %v2026_v22 }
 0x445   : > { %v2044_v59 = vadd.f32 %v2541_v34, %v2027_v50 }
 0x447   : > { %2060 = vst [vmem:[%s3970_s17 + $0x78] sm:$0xff] %v2044_v59 }
 0x448   : > { %2749 = shalt.err (!%p2746_p13)
}
 0x449   : > { %s2893_s20 = smov 128   ;;  %s2894_s7 = smov 8  }
 0x44a   : > { %2366 = dma.vmem_to_hbm [thread:$0]  (%p3156_p5), %s2078_s6, 2048, %s2080_s11, %s2062_s3, %s2893_s20, %s2893_s20, %s2894_s7  }
 0x44b PF: > { %p2399_p12 = scmp.ge.s32.totalorder %s2884_s30, 2  ;;  %s2094_s27 = sand.u32 1, %s2856_s23  }
 0x44c   : > { %s2095_s2 = scalar_lea.sflag [#allocation5], %s2094_s27 }
 0x44d   : > { %p2389_p7 = pnand %p2399_p12, %p3160_p11 }
 0x44f   : > { %p2390_p6 = pneg %p2389_p7 }
 0x451   : > { %2827 = dma.done.wait (%p2390_p6), %s2095_s2, 2048  }
 0x452   : > { %2829 = vsyncadd (%p2390_p6), %s2095_s2, 4294965248  ;;  %s32_s30 = sadd.s32 1, %s2884_s30   ;;  %s4222_s4 = sld [smem:[#allocation22_spill]] }
 0x453   : > { %p4040_p1 = scmp.ge.s32.totalorder %s32_s30, 6   ;;  %s4223_s20 = sld [smem:[#allocation23_spill]] }
 0x454   : > { %s4224_s21 = sld [smem:[#allocation24_spill]]  ;;  %s4234_s18 = smov %s2840_s19 }
 0x455   : > { %s4225_s22 = sld [smem:[#allocation36_spill]]  ;;  %s4235_s19 = smov %s3202_s15 }
 0x456   : > { %s4226_s5 = sld [smem:[#allocation25_spill]]  ;;  %s4236_s23 = smov %s2860_s24 }
 0x457   : > { %s4227_s25 = sld [smem:[#allocation37_spill]] }
 0x458   : > { %s4228_s26 = sld [smem:[#allocation28_spill]]  ;;  %s4233_s17 = smov %s4222_s4 }
 0x459   : > { %s4229_s27 = sld [smem:[#allocation29_spill]]  ;;  %31 = sbr.rel (!%p4040_p1) target bundleno = 27 (0x1b), region = 145 }
 0x45a   : > { %s4230_s28 = sld [smem:[#allocation31_spill]] }
 0x45b   : > { %s4231_s29 = sld [smem:[#allocation32_spill]] }
 0x45c   : > { %s4237_s24 = smov %s4226_s5 }
 0x45e   :  { %2101 = vsyncpa [#allocation4], 1 }
 0x45f   :  { %2103 = vsyncpa [#allocation4 + $0x1], 1 }
 0x460   :  { %2104 = vsyncpa [#allocation7], 1 }
 0x461   :  { %2106 = vsyncpa [#allocation7 + $0x1], 1 }
 0x462   :  { %2107 = vsyncpa [#allocation10], 1 }
 0x463   :  { %2108 = vsyncpa [#allocation13], 1 }
 0x464   :  { %2109 = vsyncpa [#allocation5], 1 }
 0x465   :  { %2111 = vsyncpa [#allocation5 + $0x1], 1 }

</bundles_post_ra>
